<compile_context>
chip_gen: v7x
topology: tpu7x:2x2x1
jax: 0.10.0
libtpu: 0.0.40
codegen_flags: <defaults>
</compile_context>

<pallas_src>
import functools

import jax
import jax.numpy as jnp
from jax.experimental import pallas as pl
from jax.experimental.pallas import tpu as pltpu

# ----- hyper-parameters (from the PyTorch module) -----
N_EMBD = 32
BLOCK_SIZE = 8                      # T (sequence length)
NUM_HEADS = 4
HEAD_SIZE = N_EMBD // NUM_HEADS     # 8
VOCAB_SIZE = 65                     # len(chars) in the original script
VOCAB_PAD = 128                     # lane-dense padded vocab
NEG_BIG = -1e30                     # finite additive causal mask value


def _round_up(x: int, m: int) -> int:
    return (x + m - 1) // m * m


def _pick_batch_tile(B: int) -> int:
    """Batch elements per grid step: large tiles amortize the ~0.35us/step
    overhead, capped at 128 (VMEM headroom), and >=2 steps when possible so
    v7x's two TensorCores both get work."""
    if B <= 8:
        return B
    half = _round_up(B, 16) // 2          # multiple of 8, gives >=2 grid steps
    return max(8, min(128, half))


def bigram_kernel(idx_ref, tok_ref, pos_ref, wqkv_ref, wf_ref, bf_ref,
                  wl_ref, bl_ref, out_ref):
    """One grid step == `bt` batch elements (rows = bt*T token rows).

    idx_ref : (rows, 1) int32 token ids, row-major over (batch, t)
    tok_ref : (VOCAB_PAD, C)  token embedding table (zero-padded rows)
    pos_ref : (T, C)          position embedding table
    wqkv_ref: (C, 3C)         fused [Wq | Wk | Wv], per-head blocks of width Hs
    wf_ref  : (C, C), bf_ref : (1, C)          feed-forward Linear
    wl_ref  : (C, VOCAB_PAD), bl_ref : (1, VOCAB_PAD)   lm_head (padded cols)
    out_ref : (rows, VOCAB_PAD) f32 logits (lane-dense store)
    """
    rows = idx_ref.shape[0]
    vpad, c = tok_ref.shape
    t = pos_ref.shape[0]
    bt = rows // t
    hs, nh = HEAD_SIZE, NUM_HEADS
    cdt = tok_ref.dtype                      # matmul operand dtype (f32 or bf16)

    # ---- in-kernel embedding gather: one-hot (rows, VOCAB_PAD) @ table ----
    ids = idx_ref[...]                                               # (rows, 1)
    vocab_iota = jax.lax.broadcasted_iota(jnp.int32, (rows, vpad), 1)
    onehot = (ids == vocab_iota).astype(jnp.float32).astype(cdt)     # (rows, vpad)
    tok = jnp.dot(onehot, tok_ref[...], preferred_element_type=jnp.float32)

    # ---- fused QKV projection (one wide matmul); pos folded via linearity ----
    qkv = jnp.dot(tok.astype(cdt), wqkv_ref[...],
                  preferred_element_type=jnp.float32)                # (rows, 3C)
    pos_qkv = jnp.dot(pos_ref[...], wqkv_ref[...],
                      preferred_element_type=jnp.float32)            # (T, 3C)
    qkv3 = (qkv.reshape(bt, t, 3 * c) + pos_qkv).astype(cdt)         # (bt, T, 3C)

    # additive causal mask, built once and hoisted out of the head loop
    r_io = jax.lax.broadcasted_iota(jnp.int32, (t, t), 0)
    c_io = jax.lax.broadcasted_iota(jnp.int32, (t, t), 1)
    causal = jnp.where(r_io >= c_io, 0.0, NEG_BIG).astype(jnp.float32)
    causal = jnp.broadcast_to(causal[None], (bt, t, t))

    scale = hs ** -0.5
    ff_pre = jnp.zeros((rows, c), jnp.float32)
    for h in range(nh):                                              # static unroll
        qh = qkv3[..., h * hs:(h + 1) * hs]                          # (bt, T, Hs)
        kh = qkv3[..., c + h * hs:c + (h + 1) * hs]
        vh = qkv3[..., 2 * c + h * hs:2 * c + (h + 1) * hs]

        wei = jnp.einsum('btd,bsd->bts', qh, kh,
                         preferred_element_type=jnp.float32) * scale
        wei = wei + causal
        wei = wei - jnp.max(wei, axis=-1, keepdims=True)             # f32 softmax
        p = jnp.exp(wei)
        p = p / jnp.sum(p, axis=-1, keepdims=True)

        attn = jnp.einsum('bts,bsd->btd', p.astype(cdt), vh,
                          preferred_element_type=jnp.float32)        # (bt, T, Hs)
        # head-concat folded into the FF matmul:
        #   concat(heads) @ Wf == sum_h head_h @ Wf[h*Hs:(h+1)*Hs, :]
        ff_pre = ff_pre + jnp.dot(attn.reshape(rows, hs).astype(cdt),
                                  wf_ref[h * hs:(h + 1) * hs, :],
                                  preferred_element_type=jnp.float32)

    ff = jnp.maximum(ff_pre + bf_ref[...], 0.0)                      # f32 ReLU

    logits = jnp.dot(ff.astype(cdt), wl_ref[...],
                     preferred_element_type=jnp.float32) + bl_ref[...]
    out_ref[...] = logits.astype(out_ref.dtype)


@functools.partial(jax.jit, static_argnames=("compute_dtype", "batch_tile"))
def bigram_forward(idx, params, *, compute_dtype=jnp.float32, batch_tile=None):
    """idx: (B, T) int32 token ids. Returns (logits (B, T, VOCAB_SIZE) f32, None)."""
    B, T = idx.shape
    C, V, VP = N_EMBD, VOCAB_SIZE, VOCAB_PAD
    cdt = compute_dtype

    bt = batch_tile if batch_tile is not None else _pick_batch_tile(B)
    if (bt * T) % 8 != 0:
        bt = B                     # fall back to a single step (block == full array)
    Bp = _round_up(B, bt)
    grid = (Bp // bt,)
    rows_blk = bt * T

    # pad the batch (extra rows read token 0, results sliced off) and flatten
    idx_pad = jnp.zeros((Bp, T), jnp.int32).at[:B].set(idx.astype(jnp.int32))
    idx_rows = idx_pad.reshape(Bp * T, 1)

    # lane-dense (128) vocab padding for the table / lm_head / logits
    tok_pad = jnp.zeros((VP, C), cdt).at[:V].set(params["tok_table"].astype(cdt))
    wl_pad = jnp.zeros((C, VP), cdt).at[:, :V].set(params["wl"].astype(cdt))
    bl_pad = jnp.zeros((1, VP), jnp.float32).at[:, :V].set(
        params["bl"].astype(jnp.float32))

    # fuse the per-head (H, C, Hs) projections into one (C, 3C) weight [Q|K|V]
    def to_full(w):                        # (H, C, Hs) -> (C, H*Hs)
        return jnp.transpose(w, (1, 0, 2)).reshape(C, C).astype(cdt)
    wqkv = jnp.concatenate(
        [to_full(params["wq"]), to_full(params["wk"]), to_full(params["wv"])],
        axis=1)

    pos = params["pos_table"][:T].astype(cdt)
    wf = params["wf"].astype(cdt)
    bf = params["bf"].astype(jnp.float32)         # biases added post-matmul in f32

    logits_rows = pl.pallas_call(
        bigram_kernel,
        out_shape=jax.ShapeDtypeStruct((Bp * T, VP), jnp.float32),
        grid_spec=pltpu.PrefetchScalarGridSpec(
            num_scalar_prefetch=0,
            grid=grid,
            in_specs=[
                pl.BlockSpec((rows_blk, 1), lambda b: (b, 0)),    # token ids
                pl.BlockSpec((VP, C), lambda b: (0, 0)),          # tok table (resident)
                pl.BlockSpec((T, C), lambda b: (0, 0)),           # pos table
                pl.BlockSpec((C, 3 * C), lambda b: (0, 0)),       # fused Wqkv
                pl.BlockSpec((C, C), lambda b: (0, 0)),           # Wf
                pl.BlockSpec((1, C), lambda b: (0, 0)),           # bf
                pl.BlockSpec((C, VP), lambda b: (0, 0)),          # Wl (lane-padded)
                pl.BlockSpec((1, VP), lambda b: (0, 0)),          # bl (lane-padded)
            ],
            out_specs=pl.BlockSpec((rows_blk, VP), lambda b: (b, 0)),
        ),
        compiler_params=pltpu.CompilerParams(
            dimension_semantics=("parallel",),       # batch groups are independent
            vmem_limit_bytes=32 * 1024 * 1024,       # bt<=128 uses only a few MiB
        ),
    )(idx_rows, tok_pad, pos, wqkv, wf, bf, wl_pad, bl_pad)

    logits = logits_rows.reshape(Bp, T, VP)[:B, :, :V]
    # TODO(synk): cross-entropy loss (targets path) and generate()'s multinomial
    # sampling loop stay in plain JAX; they are not part of this kernel.
    loss = None
    return logits, loss


def init_params(key):
    """Deterministic synthetic init matching the PyTorch module's shapes."""
    ks = jax.random.split(key, 9)
    scale = 0.02
    return {
        "tok_table": scale * jax.random.normal(ks[0], (VOCAB_SIZE, N_EMBD), jnp.float32),
        "pos_table": scale * jax.random.normal(ks[1], (BLOCK_SIZE, N_EMBD), jnp.float32),
        # per-head projections stacked along leading axis: (H, C, Hs)
        "wq": scale * jax.random.normal(ks[2], (NUM_HEADS, N_EMBD, HEAD_SIZE), jnp.float32),
        "wk": scale * jax.random.normal(ks[3], (NUM_HEADS, N_EMBD, HEAD_SIZE), jnp.float32),
        "wv": scale * jax.random.normal(ks[4], (NUM_HEADS, N_EMBD, HEAD_SIZE), jnp.float32),
        # feed-forward Linear (stored as (in, out); bias as (1, out))
        "wf": scale * jax.random.normal(ks[5], (N_EMBD, N_EMBD), jnp.float32),
        "bf": scale * jax.random.normal(ks[6], (1, N_EMBD), jnp.float32),
        # lm_head Linear
        "wl": scale * jax.random.normal(ks[7], (N_EMBD, VOCAB_SIZE), jnp.float32),
        "bl": scale * jax.random.normal(ks[8], (1, VOCAB_SIZE), jnp.float32),
    }


def reference_forward(idx, params):
    """Pure-JAX reference (mirrors the PyTorch module) for a correctness check."""
    B, T = idx.shape
    x = params["tok_table"][idx] + params["pos_table"][jnp.arange(T)][None]
    row = jnp.arange(T)[:, None]
    col = jnp.arange(T)[None, :]
    causal = row >= col
    heads = []
    for h in range(NUM_HEADS):
        q = x @ params["wq"][h]
        k = x @ params["wk"][h]
        v = x @ params["wv"][h]
        wei = (q @ jnp.swapaxes(k, -2, -1)) * HEAD_SIZE ** (-0.5)
        wei = jnp.where(causal[None], wei, -jnp.inf)
        wei = jax.nn.softmax(wei, axis=-1)
        heads.append(wei @ v)
    sa = jnp.concatenate(heads, axis=-1)
    ff = jnp.maximum(sa @ params["wf"] + params["bf"][0], 0.0)
    return ff @ params["wl"] + params["bl"][0]


if __name__ == "__main__":
    key = jax.random.PRNGKey(0)
    pkey, ikey = jax.random.split(key)
    params = init_params(pkey)

    B, T = 16, BLOCK_SIZE                      # -> batch tile 8, grid of 2 steps
    idx = jax.random.randint(ikey, (B, T), 0, VOCAB_SIZE, jnp.int32)

    ref = reference_forward(idx, params)

    # f32 path: exact check vs the pure-JAX reference
    logits, loss = bigram_forward(idx, params)
    logits = jax.block_until_ready(logits)
    assert logits.shape == (B, T, VOCAB_SIZE)
    assert loss is None
    assert jnp.allclose(logits, ref, atol=1e-5, rtol=1e-5)

    # bf16 matmul-operand path (v6e/v7x-friendly); vector math stays f32 in-kernel
    logits_bf16, _ = bigram_forward(idx, params, compute_dtype=jnp.bfloat16)
    logits_bf16 = jax.block_until_ready(logits_bf16)
    assert bool(jnp.all(jnp.isfinite(logits_bf16)))
    assert jnp.allclose(logits_bf16, ref, atol=2e-2, rtol=2e-1)

    print("KERNEL_OK")
</pallas_src>

<mosaic_0001>
module attributes {stable_mosaic.version = 11 : i64} {
  func.func @bigram_kernel(%arg0: i32, %arg1: memref<64x1xi32, #tpu.memory_space<vmem>>, %arg2: memref<128x32xf32, #tpu.memory_space<vmem>>, %arg3: memref<8x32xf32, #tpu.memory_space<vmem>>, %arg4: memref<32x96xf32, #tpu.memory_space<vmem>>, %arg5: memref<32x32xf32, #tpu.memory_space<vmem>>, %arg6: memref<1x32xf32, #tpu.memory_space<vmem>>, %arg7: memref<32x128xf32, #tpu.memory_space<vmem>>, %arg8: memref<1x128xf32, #tpu.memory_space<vmem>>, %arg9: memref<64x128xf32, #tpu.memory_space<vmem>>) attributes {dimension_semantics = [#tpu.dimension_semantics<parallel>], iteration_bounds = array<i64: 2>, scalar_prefetch = 0 : i64, scratch_operands = 0 : i64, tpu.core_type = #tpu.core_type<tc>, window_params = [{transform_indices = @transform_0, window_bounds = array<i64: 64, 1>}, {pipeline_mode = #tpu.pipeline_mode<synchronous>, transform_indices = @transform_1, window_bounds = array<i64: 128, 32>}, {pipeline_mode = #tpu.pipeline_mode<synchronous>, transform_indices = @transform_2, window_bounds = array<i64: 8, 32>}, {pipeline_mode = #tpu.pipeline_mode<synchronous>, transform_indices = @transform_3, window_bounds = array<i64: 32, 96>}, {pipeline_mode = #tpu.pipeline_mode<synchronous>, transform_indices = @transform_4, window_bounds = array<i64: 32, 32>}, {pipeline_mode = #tpu.pipeline_mode<synchronous>, transform_indices = @transform_5, window_bounds = array<i64: 1, 32>}, {pipeline_mode = #tpu.pipeline_mode<synchronous>, transform_indices = @transform_6, window_bounds = array<i64: 32, 128>}, {pipeline_mode = #tpu.pipeline_mode<synchronous>, transform_indices = @transform_7, window_bounds = array<i64: 1, 128>}, {transform_indices = @transform_8, window_bounds = array<i64: 64, 128>}]} {
    %c0 = arith.constant 0 : index
    %c0_0 = arith.constant 0 : index
    %0 = vector.load %arg1[%c0, %c0_0] : memref<64x1xi32, #tpu.memory_space<vmem>>, vector<64x1xi32>
    %1 = tpu.iota {dimensions = array<i32: 1>} : vector<64x128xi32>
    %2 = vector.broadcast %0 : vector<64x1xi32> to vector<64x128xi32>
    %3 = arith.cmpi eq, %2, %1 : vector<64x128xi32>
    %4 = arith.extui %3 : vector<64x128xi1> to vector<64x128xi32>
    %5 = arith.sitofp %4 : vector<64x128xi32> to vector<64x128xf32>
    %c0_1 = arith.constant 0 : index
    %c0_2 = arith.constant 0 : index
    %6 = vector.load %arg2[%c0_1, %c0_2] : memref<128x32xf32, #tpu.memory_space<vmem>>, vector<128x32xf32>
    %cst = arith.constant dense<0.000000e+00> : vector<64x32xf32>
    %7 = tpu.matmul %5, %6, %cst {dimension_numbers = #tpu.dot_dimension_numbers<[1], [0], [0], [1], [0, 0, 1, 1], [], []>} : vector<64x128xf32>, vector<128x32xf32>, vector<64x32xf32> -> vector<64x32xf32>
    %c0_3 = arith.constant 0 : index
    %c0_4 = arith.constant 0 : index
    %8 = vector.load %arg4[%c0_3, %c0_4] : memref<32x96xf32, #tpu.memory_space<vmem>>, vector<32x96xf32>
    %cst_5 = arith.constant dense<0.000000e+00> : vector<64x96xf32>
    %9 = tpu.matmul %7, %8, %cst_5 {dimension_numbers = #tpu.dot_dimension_numbers<[1], [0], [0], [1], [0, 0, 1, 1], [], []>} : vector<64x32xf32>, vector<32x96xf32>, vector<64x96xf32> -> vector<64x96xf32>
    %c0_6 = arith.constant 0 : index
    %c0_7 = arith.constant 0 : index
    %10 = vector.load %arg3[%c0_6, %c0_7] : memref<8x32xf32, #tpu.memory_space<vmem>>, vector<8x32xf32>
    %c0_8 = arith.constant 0 : index
    %c0_9 = arith.constant 0 : index
    %11 = vector.load %arg4[%c0_8, %c0_9] : memref<32x96xf32, #tpu.memory_space<vmem>>, vector<32x96xf32>
    %cst_10 = arith.constant dense<0.000000e+00> : vector<8x96xf32>
    %12 = tpu.matmul %10, %11, %cst_10 {dimension_numbers = #tpu.dot_dimension_numbers<[1], [0], [0], [1], [0, 0, 1, 1], [], []>} : vector<8x32xf32>, vector<32x96xf32>, vector<8x96xf32> -> vector<8x96xf32>
    %13 = vector.shape_cast %9 : vector<64x96xf32> to vector<8x8x96xf32>
    %14 = vector.shape_cast %12 : vector<8x96xf32> to vector<1x8x96xf32>
    %15 = vector.broadcast %14 : vector<1x8x96xf32> to vector<8x8x96xf32>
    %16 = arith.addf %13, %15 : vector<8x8x96xf32>
    %17 = tpu.iota {dimensions = array<i32: 0>} : vector<8x8xi32>
    %18 = tpu.iota {dimensions = array<i32: 1>} : vector<8x8xi32>
    %19 = arith.cmpi sge, %17, %18 : vector<8x8xi32>
    %cst_11 = arith.constant 0.000000e+00 : f32
    %cst_12 = arith.constant -1.000000e+30 : f32
    %20 = vector.broadcast %cst_11 : f32 to vector<8x8xf32>
    %21 = vector.broadcast %cst_12 : f32 to vector<8x8xf32>
    %22 = arith.select %19, %20, %21 : vector<8x8xi1>, vector<8x8xf32>
    %23 = vector.shape_cast %22 : vector<8x8xf32> to vector<1x8x8xf32>
    %24 = vector.shape_cast %23 : vector<1x8x8xf32> to vector<1x8x8xf32>
    %25 = vector.broadcast %24 : vector<1x8x8xf32> to vector<8x8x8xf32>
    %cst_13 = arith.constant 0.000000e+00 : f32
    %26 = vector.broadcast %cst_13 : f32 to vector<64x32xf32>
    %27 = vector.extract_strided_slice %16 {offsets = [0, 0, 0], sizes = [8, 8, 8], strides = [1, 1, 1]} : vector<8x8x96xf32> to vector<8x8x8xf32>
    %28 = vector.extract_strided_slice %16 {offsets = [0, 0, 32], sizes = [8, 8, 8], strides = [1, 1, 1]} : vector<8x8x96xf32> to vector<8x8x8xf32>
    %29 = vector.extract_strided_slice %16 {offsets = [0, 0, 64], sizes = [8, 8, 8], strides = [1, 1, 1]} : vector<8x8x96xf32> to vector<8x8x8xf32>
    "tpu.trace_start"() <{level = 10 : i32, message = "btd,bsd->bts"}> : () -> ()
    %cst_14 = arith.constant dense<0.000000e+00> : vector<8x8x8xf32>
    %30 = tpu.matmul %27, %28, %cst_14 {dimension_numbers = #tpu.dot_dimension_numbers<[2], [2], [1], [1], [0, 0, 0, 1, 1, 1], [0], [0]>} : vector<8x8x8xf32>, vector<8x8x8xf32>, vector<8x8x8xf32> -> vector<8x8x8xf32>
    "tpu.trace_stop"() : () -> ()
    %cst_15 = arith.constant 0.353553385 : f32
    %31 = vector.broadcast %cst_15 : f32 to vector<8x8x8xf32>
    %32 = arith.mulf %30, %31 : vector<8x8x8xf32>
    %33 = arith.addf %32, %25 : vector<8x8x8xf32>
    %cst_16 = arith.constant dense<0xFF800000> : vector<8x8xf32>
    %34 = vector.multi_reduction <maximumf>, %33, %cst_16 [2] : vector<8x8x8xf32> to vector<8x8xf32>
    %35 = vector.shape_cast %34 : vector<8x8xf32> to vector<8x8x1xf32>
    %36 = vector.broadcast %35 : vector<8x8x1xf32> to vector<8x8x8xf32>
    %37 = arith.subf %33, %36 : vector<8x8x8xf32>
    %38 = math.exp %37 : vector<8x8x8xf32>
    %cst_17 = arith.constant dense<0.000000e+00> : vector<8x8xf32>
    %39 = vector.multi_reduction <add>, %38, %cst_17 [2] : vector<8x8x8xf32> to vector<8x8xf32>
    %40 = vector.shape_cast %39 : vector<8x8xf32> to vector<8x8x1xf32>
    %41 = vector.broadcast %40 : vector<8x8x1xf32> to vector<8x8x8xf32>
    %42 = arith.divf %38, %41 : vector<8x8x8xf32>
    "tpu.trace_start"() <{level = 10 : i32, message = "bts,bsd->btd"}> : () -> ()
    %cst_18 = arith.constant dense<0.000000e+00> : vector<8x8x8xf32>
    %43 = tpu.matmul %42, %29, %cst_18 {dimension_numbers = #tpu.dot_dimension_numbers<[2], [1], [1], [2], [0, 0, 0, 1, 1, 2], [0], [0]>} : vector<8x8x8xf32>, vector<8x8x8xf32>, vector<8x8x8xf32> -> vector<8x8x8xf32>
    "tpu.trace_stop"() : () -> ()
    %44 = vector.shape_cast %43 : vector<8x8x8xf32> to vector<64x8xf32>
    %c0_19 = arith.constant 0 : index
    %c0_20 = arith.constant 0 : index
    %45 = vector.load %arg5[%c0_19, %c0_20] : memref<32x32xf32, #tpu.memory_space<vmem>>, vector<8x32xf32>
    %cst_21 = arith.constant dense<0.000000e+00> : vector<64x32xf32>
    %46 = tpu.matmul %44, %45, %cst_21 {dimension_numbers = #tpu.dot_dimension_numbers<[1], [0], [0], [1], [0, 0, 1, 1], [], []>} : vector<64x8xf32>, vector<8x32xf32>, vector<64x32xf32> -> vector<64x32xf32>
    %47 = arith.addf %26, %46 : vector<64x32xf32>
    %48 = vector.extract_strided_slice %16 {offsets = [0, 0, 8], sizes = [8, 8, 8], strides = [1, 1, 1]} : vector<8x8x96xf32> to vector<8x8x8xf32>
    %49 = vector.extract_strided_slice %16 {offsets = [0, 0, 40], sizes = [8, 8, 8], strides = [1, 1, 1]} : vector<8x8x96xf32> to vector<8x8x8xf32>
    %50 = vector.extract_strided_slice %16 {offsets = [0, 0, 72], sizes = [8, 8, 8], strides = [1, 1, 1]} : vector<8x8x96xf32> to vector<8x8x8xf32>
    "tpu.trace_start"() <{level = 10 : i32, message = "btd,bsd->bts"}> : () -> ()
    %cst_22 = arith.constant dense<0.000000e+00> : vector<8x8x8xf32>
    %51 = tpu.matmul %48, %49, %cst_22 {dimension_numbers = #tpu.dot_dimension_numbers<[2], [2], [1], [1], [0, 0, 0, 1, 1, 1], [0], [0]>} : vector<8x8x8xf32>, vector<8x8x8xf32>, vector<8x8x8xf32> -> vector<8x8x8xf32>
    "tpu.trace_stop"() : () -> ()
    %cst_23 = arith.constant 0.353553385 : f32
    %52 = vector.broadcast %cst_23 : f32 to vector<8x8x8xf32>
    %53 = arith.mulf %51, %52 : vector<8x8x8xf32>
    %54 = arith.addf %53, %25 : vector<8x8x8xf32>
    %cst_24 = arith.constant dense<0xFF800000> : vector<8x8xf32>
    %55 = vector.multi_reduction <maximumf>, %54, %cst_24 [2] : vector<8x8x8xf32> to vector<8x8xf32>
    %56 = vector.shape_cast %55 : vector<8x8xf32> to vector<8x8x1xf32>
    %57 = vector.broadcast %56 : vector<8x8x1xf32> to vector<8x8x8xf32>
    %58 = arith.subf %54, %57 : vector<8x8x8xf32>
    %59 = math.exp %58 : vector<8x8x8xf32>
    %cst_25 = arith.constant dense<0.000000e+00> : vector<8x8xf32>
    %60 = vector.multi_reduction <add>, %59, %cst_25 [2] : vector<8x8x8xf32> to vector<8x8xf32>
    %61 = vector.shape_cast %60 : vector<8x8xf32> to vector<8x8x1xf32>
    %62 = vector.broadcast %61 : vector<8x8x1xf32> to vector<8x8x8xf32>
    %63 = arith.divf %59, %62 : vector<8x8x8xf32>
    "tpu.trace_start"() <{level = 10 : i32, message = "bts,bsd->btd"}> : () -> ()
    %cst_26 = arith.constant dense<0.000000e+00> : vector<8x8x8xf32>
    %64 = tpu.matmul %63, %50, %cst_26 {dimension_numbers = #tpu.dot_dimension_numbers<[2], [1], [1], [2], [0, 0, 0, 1, 1, 2], [0], [0]>} : vector<8x8x8xf32>, vector<8x8x8xf32>, vector<8x8x8xf32> -> vector<8x8x8xf32>
    "tpu.trace_stop"() : () -> ()
    %65 = vector.shape_cast %64 : vector<8x8x8xf32> to vector<64x8xf32>
    %c8 = arith.constant 8 : index
    %c0_27 = arith.constant 0 : index
    %66 = vector.load %arg5[%c8, %c0_27] : memref<32x32xf32, #tpu.memory_space<vmem>>, vector<8x32xf32>
    %cst_28 = arith.constant dense<0.000000e+00> : vector<64x32xf32>
    %67 = tpu.matmul %65, %66, %cst_28 {dimension_numbers = #tpu.dot_dimension_numbers<[1], [0], [0], [1], [0, 0, 1, 1], [], []>} : vector<64x8xf32>, vector<8x32xf32>, vector<64x32xf32> -> vector<64x32xf32>
    %68 = arith.addf %47, %67 : vector<64x32xf32>
    %69 = vector.extract_strided_slice %16 {offsets = [0, 0, 16], sizes = [8, 8, 8], strides = [1, 1, 1]} : vector<8x8x96xf32> to vector<8x8x8xf32>
    %70 = vector.extract_strided_slice %16 {offsets = [0, 0, 48], sizes = [8, 8, 8], strides = [1, 1, 1]} : vector<8x8x96xf32> to vector<8x8x8xf32>
    %71 = vector.extract_strided_slice %16 {offsets = [0, 0, 80], sizes = [8, 8, 8], strides = [1, 1, 1]} : vector<8x8x96xf32> to vector<8x8x8xf32>
    "tpu.trace_start"() <{level = 10 : i32, message = "btd,bsd->bts"}> : () -> ()
    %cst_29 = arith.constant dense<0.000000e+00> : vector<8x8x8xf32>
    %72 = tpu.matmul %69, %70, %cst_29 {dimension_numbers = #tpu.dot_dimension_numbers<[2], [2], [1], [1], [0, 0, 0, 1, 1, 1], [0], [0]>} : vector<8x8x8xf32>, vector<8x8x8xf32>, vector<8x8x8xf32> -> vector<8x8x8xf32>
    "tpu.trace_stop"() : () -> ()
    %cst_30 = arith.constant 0.353553385 : f32
    %73 = vector.broadcast %cst_30 : f32 to vector<8x8x8xf32>
    %74 = arith.mulf %72, %73 : vector<8x8x8xf32>
    %75 = arith.addf %74, %25 : vector<8x8x8xf32>
    %cst_31 = arith.constant dense<0xFF800000> : vector<8x8xf32>
    %76 = vector.multi_reduction <maximumf>, %75, %cst_31 [2] : vector<8x8x8xf32> to vector<8x8xf32>
    %77 = vector.shape_cast %76 : vector<8x8xf32> to vector<8x8x1xf32>
    %78 = vector.broadcast %77 : vector<8x8x1xf32> to vector<8x8x8xf32>
    %79 = arith.subf %75, %78 : vector<8x8x8xf32>
    %80 = math.exp %79 : vector<8x8x8xf32>
    %cst_32 = arith.constant dense<0.000000e+00> : vector<8x8xf32>
    %81 = vector.multi_reduction <add>, %80, %cst_32 [2] : vector<8x8x8xf32> to vector<8x8xf32>
    %82 = vector.shape_cast %81 : vector<8x8xf32> to vector<8x8x1xf32>
    %83 = vector.broadcast %82 : vector<8x8x1xf32> to vector<8x8x8xf32>
    %84 = arith.divf %80, %83 : vector<8x8x8xf32>
    "tpu.trace_start"() <{level = 10 : i32, message = "bts,bsd->btd"}> : () -> ()
    %cst_33 = arith.constant dense<0.000000e+00> : vector<8x8x8xf32>
    %85 = tpu.matmul %84, %71, %cst_33 {dimension_numbers = #tpu.dot_dimension_numbers<[2], [1], [1], [2], [0, 0, 0, 1, 1, 2], [0], [0]>} : vector<8x8x8xf32>, vector<8x8x8xf32>, vector<8x8x8xf32> -> vector<8x8x8xf32>
    "tpu.trace_stop"() : () -> ()
    %86 = vector.shape_cast %85 : vector<8x8x8xf32> to vector<64x8xf32>
    %c16 = arith.constant 16 : index
    %c0_34 = arith.constant 0 : index
    %87 = vector.load %arg5[%c16, %c0_34] : memref<32x32xf32, #tpu.memory_space<vmem>>, vector<8x32xf32>
    %cst_35 = arith.constant dense<0.000000e+00> : vector<64x32xf32>
    %88 = tpu.matmul %86, %87, %cst_35 {dimension_numbers = #tpu.dot_dimension_numbers<[1], [0], [0], [1], [0, 0, 1, 1], [], []>} : vector<64x8xf32>, vector<8x32xf32>, vector<64x32xf32> -> vector<64x32xf32>
    %89 = arith.addf %68, %88 : vector<64x32xf32>
    %90 = vector.extract_strided_slice %16 {offsets = [0, 0, 24], sizes = [8, 8, 8], strides = [1, 1, 1]} : vector<8x8x96xf32> to vector<8x8x8xf32>
    %91 = vector.extract_strided_slice %16 {offsets = [0, 0, 56], sizes = [8, 8, 8], strides = [1, 1, 1]} : vector<8x8x96xf32> to vector<8x8x8xf32>
    %92 = vector.extract_strided_slice %16 {offsets = [0, 0, 88], sizes = [8, 8, 8], strides = [1, 1, 1]} : vector<8x8x96xf32> to vector<8x8x8xf32>
    "tpu.trace_start"() <{level = 10 : i32, message = "btd,bsd->bts"}> : () -> ()
    %cst_36 = arith.constant dense<0.000000e+00> : vector<8x8x8xf32>
    %93 = tpu.matmul %90, %91, %cst_36 {dimension_numbers = #tpu.dot_dimension_numbers<[2], [2], [1], [1], [0, 0, 0, 1, 1, 1], [0], [0]>} : vector<8x8x8xf32>, vector<8x8x8xf32>, vector<8x8x8xf32> -> vector<8x8x8xf32>
    "tpu.trace_stop"() : () -> ()
    %cst_37 = arith.constant 0.353553385 : f32
    %94 = vector.broadcast %cst_37 : f32 to vector<8x8x8xf32>
    %95 = arith.mulf %93, %94 : vector<8x8x8xf32>
    %96 = arith.addf %95, %25 : vector<8x8x8xf32>
    %cst_38 = arith.constant dense<0xFF800000> : vector<8x8xf32>
    %97 = vector.multi_reduction <maximumf>, %96, %cst_38 [2] : vector<8x8x8xf32> to vector<8x8xf32>
    %98 = vector.shape_cast %97 : vector<8x8xf32> to vector<8x8x1xf32>
    %99 = vector.broadcast %98 : vector<8x8x1xf32> to vector<8x8x8xf32>
    %100 = arith.subf %96, %99 : vector<8x8x8xf32>
    %101 = math.exp %100 : vector<8x8x8xf32>
    %cst_39 = arith.constant dense<0.000000e+00> : vector<8x8xf32>
    %102 = vector.multi_reduction <add>, %101, %cst_39 [2] : vector<8x8x8xf32> to vector<8x8xf32>
    %103 = vector.shape_cast %102 : vector<8x8xf32> to vector<8x8x1xf32>
    %104 = vector.broadcast %103 : vector<8x8x1xf32> to vector<8x8x8xf32>
    %105 = arith.divf %101, %104 : vector<8x8x8xf32>
    "tpu.trace_start"() <{level = 10 : i32, message = "bts,bsd->btd"}> : () -> ()
    %cst_40 = arith.constant dense<0.000000e+00> : vector<8x8x8xf32>
    %106 = tpu.matmul %105, %92, %cst_40 {dimension_numbers = #tpu.dot_dimension_numbers<[2], [1], [1], [2], [0, 0, 0, 1, 1, 2], [0], [0]>} : vector<8x8x8xf32>, vector<8x8x8xf32>, vector<8x8x8xf32> -> vector<8x8x8xf32>
    "tpu.trace_stop"() : () -> ()
    %107 = vector.shape_cast %106 : vector<8x8x8xf32> to vector<64x8xf32>
    %c24 = arith.constant 24 : index
    %c0_41 = arith.constant 0 : index
    %108 = vector.load %arg5[%c24, %c0_41] : memref<32x32xf32, #tpu.memory_space<vmem>>, vector<8x32xf32>
    %cst_42 = arith.constant dense<0.000000e+00> : vector<64x32xf32>
    %109 = tpu.matmul %107, %108, %cst_42 {dimension_numbers = #tpu.dot_dimension_numbers<[1], [0], [0], [1], [0, 0, 1, 1], [], []>} : vector<64x8xf32>, vector<8x32xf32>, vector<64x32xf32> -> vector<64x32xf32>
    %110 = arith.addf %89, %109 : vector<64x32xf32>
    %c0_43 = arith.constant 0 : index
    %c0_44 = arith.constant 0 : index
    %111 = vector.load %arg6[%c0_43, %c0_44] : memref<1x32xf32, #tpu.memory_space<vmem>>, vector<1x32xf32>
    %112 = vector.broadcast %111 : vector<1x32xf32> to vector<64x32xf32>
    %113 = arith.addf %110, %112 : vector<64x32xf32>
    %cst_45 = arith.constant 0.000000e+00 : f32
    %114 = vector.broadcast %cst_45 : f32 to vector<64x32xf32>
    %115 = arith.maximumf %113, %114 : vector<64x32xf32>
    %c0_46 = arith.constant 0 : index
    %c0_47 = arith.constant 0 : index
    %116 = vector.load %arg7[%c0_46, %c0_47] : memref<32x128xf32, #tpu.memory_space<vmem>>, vector<32x128xf32>
    %cst_48 = arith.constant dense<0.000000e+00> : vector<64x128xf32>
    %117 = tpu.matmul %115, %116, %cst_48 {dimension_numbers = #tpu.dot_dimension_numbers<[1], [0], [0], [1], [0, 0, 1, 1], [], []>} : vector<64x32xf32>, vector<32x128xf32>, vector<64x128xf32> -> vector<64x128xf32>
    %c0_49 = arith.constant 0 : index
    %c0_50 = arith.constant 0 : index
    %118 = vector.load %arg8[%c0_49, %c0_50] : memref<1x128xf32, #tpu.memory_space<vmem>>, vector<1x128xf32>
    %119 = vector.broadcast %118 : vector<1x128xf32> to vector<64x128xf32>
    %120 = arith.addf %117, %119 : vector<64x128xf32>
    %c0_51 = arith.constant 0 : index
    %c0_52 = arith.constant 0 : index
    %121 = vector.load %arg9[%c0_51, %c0_52] : memref<64x128xf32, #tpu.memory_space<vmem>>, vector<64x128xf32>
    tpu.vector_store %arg9[%c0_51, %c0_52], %120 {strides = array<i32>} : memref<64x128xf32, #tpu.memory_space<vmem>>, vector<64x128xf32>,
    return
  }
  func.func @transform_0(%arg0: i32) -> (i32, i32) {
    %c0_i32 = arith.constant 0 : i32
    %c0_i32_0 = arith.constant 0 : i32
    return %arg0, %c0_i32 : i32, i32
  }
  func.func @transform_1(%arg0: i32) -> (i32, i32) {
    %c0_i32 = arith.constant 0 : i32
    %c0_i32_0 = arith.constant 0 : i32
    %c0_i32_1 = arith.constant 0 : i32
    return %c0_i32, %c0_i32_0 : i32, i32
  }
  func.func @transform_2(%arg0: i32) -> (i32, i32) {
    %c0_i32 = arith.constant 0 : i32
    %c0_i32_0 = arith.constant 0 : i32
    %c0_i32_1 = arith.constant 0 : i32
    return %c0_i32, %c0_i32_0 : i32, i32
  }
  func.func @transform_3(%arg0: i32) -> (i32, i32) {
    %c0_i32 = arith.constant 0 : i32
    %c0_i32_0 = arith.constant 0 : i32
    %c0_i32_1 = arith.constant 0 : i32
    return %c0_i32, %c0_i32_0 : i32, i32
  }
  func.func @transform_4(%arg0: i32) -> (i32, i32) {
    %c0_i32 = arith.constant 0 : i32
    %c0_i32_0 = arith.constant 0 : i32
    %c0_i32_1 = arith.constant 0 : i32
    return %c0_i32, %c0_i32_0 : i32, i32
  }
  func.func @transform_5(%arg0: i32) -> (i32, i32) {
    %c0_i32 = arith.constant 0 : i32
    %c0_i32_0 = arith.constant 0 : i32
    %c0_i32_1 = arith.constant 0 : i32
    return %c0_i32, %c0_i32_0 : i32, i32
  }
  func.func @transform_6(%arg0: i32) -> (i32, i32) {
    %c0_i32 = arith.constant 0 : i32
    %c0_i32_0 = arith.constant 0 : i32
    %c0_i32_1 = arith.constant 0 : i32
    return %c0_i32, %c0_i32_0 : i32, i32
  }
  func.func @transform_7(%arg0: i32) -> (i32, i32) {
    %c0_i32 = arith.constant 0 : i32
    %c0_i32_0 = arith.constant 0 : i32
    %c0_i32_1 = arith.constant 0 : i32
    return %c0_i32, %c0_i32_0 : i32, i32
  }
  func.func @transform_8(%arg0: i32) -> (i32, i32) {
    %c0_i32 = arith.constant 0 : i32
    %c0_i32_0 = arith.constant 0 : i32
    return %arg0, %c0_i32 : i32, i32
  }
}

</mosaic_0001>

<bundles_post_ra>
// kernel: bigram_forward.1
= control target key start
LH: loop header
LB: loop body
LE: loop exit
PB: predicated region body
PF: predicated region fallthrough
CT: control target
= control target key end

     0   :  { %13 = vsyncpa [#allocation3], 0  ;;  %s9104_s0 = inlined_call_operand.vmem [shape: s32[128,1], index: 0, kind: input, shape index: {}]   ;;  %s9105_s1 = inlined_call_operand.vmem [shape: f32[128,32], index: 1, kind: input, shape index: {}]   ;;  %s9106_s2 = inlined_call_operand.vmem [shape: f32[8,32], index: 2, kind: input, shape index: {}]   ;;  %s9107_s3 = inlined_call_operand.vmem [shape: f32[32,96], index: 3, kind: input, shape index: {}]   ;;  %s9108_s4 = inlined_call_operand.vmem [shape: f32[32,32], index: 4, kind: input, shape index: {}]   ;;  %s9109_s5 = inlined_call_operand.vmem [shape: f32[1,32], index: 5, kind: input, shape index: {}]   ;;  %s9110_s6 = inlined_call_operand.vmem [shape: f32[32,128], index: 6, kind: input, shape index: {}]   ;;  %s9111_s7 = inlined_call_operand.vmem [shape: f32[1,128], index: 7, kind: input, shape index: {}]   ;;  %s9112_s8 = inlined_call_operand.hbm [shape: f32[128,128], index: 8, kind: output, shape index: {}]  }
   0x1   :  { %15 = vsyncpa [#allocation3 + $0x1], 0  ;;  %s8085_s27 = smov 0   ;;  %s8087_s28 = smov 0  }
   0x2   :  { %s8089_s29 = smov 0   ;;  %s8091_s30 = smov 0  }
   0x3 LB: > { %s8106_s9 = sadd.s32 4294967295, %s8018_s30   ;;  %s6826_s10 = sadd.s32 4294967294, %s8018_s30   ;;  %s8018_s30 = sphi %s8091_s30, %s9118_s30   ;;  %s8014_s29 = sphi %s8089_s29, %s9117_s29   ;;  %s8010_s28 = sphi %s8087_s28, %s9116_s28   ;;  %s8006_s27 = sphi %s8085_s27, %s9115_s27  }
   0x4   : > { %s8110_s11 = sadd.s32 1, %s8018_s30   ;;  %s201_s12 = sadd.s32 1, %s8014_s29 }
   0x5   : > { %s198_s13 = ssub.s32 %s8018_s30, %s8110_s11  ;;  %p211_p0 = scmp.ne.s32.totalorder %s8014_s29, %s8010_s28 }
   0x6   : > { %p199_p1 = scmp.eq.s32.totalorder %s198_s13, 0  ;;  %p212_p2 = scmp.eq.s32.totalorder %s8106_s9, 1 }
   0x7   : > { %p217_p3 = scmp.ne.s32.totalorder %s8010_s28, %s8006_s27  ;;  %p218_p4 = scmp.eq.s32.totalorder %s6826_s10, 1 }
   0x8   : > { %s8121_s14 = scalar_select %p199_p1, %s8014_s29, %s201_s12  }
   0x9   : > { %p8123_p5 = por %p212_p2, %p211_p0  ;;  %p8127_p6 = por %p218_p4, %p217_p3 }
   0xa   : > { %p6829_p7 = scmp.ge.s32.totalorder %s8018_s30, 1  ;;  %p266_p8 = scmp.lt.s32.totalorder %s8018_s30, 3 }
   0xc   : > { %p267_p9 = pnand %p6829_p7, %p266_p8 }
   0xd   : > { %s6831_s17 = sshll.u32 (!%p267_p9), %s8106_s9, 3  ;;  %v365_v0 = vld [vmem:[%s9105_s1] sm:$0xff] (!%p267_p9)  ;;  %v366_v1 = vld [vmem:[%s9105_s1 + $0x8] sm:$0xff] (!%p267_p9)  ;;  %v367_v2 = vld [vmem:[%s9105_s1 + $0x10] sm:$0xff] (!%p267_p9)  ;;  %v8020_v3 = vmov (!%p267_p9), 0   ;;  %v315_v39 = vlaneseq (!%p267_p9)  ;;  %v8021_v43 = vmov (!%p267_p9), 1.0  }
   0xe   : > { %270 = sbr.rel (%p267_p9) target bundleno = 3878 (0xf26), region = 52  ;;  %7827 = vset.pattern.permute.xlu1 (!%p267_p9), %v8020_v3  ;;  %7826 = vset.pattern.permute.xlu0 (!%p267_p9), %v8020_v3  ;;  %p301_p10 = scmp.lt.s32.totalorder (!%p267_p9), %s6831_s17, 15  ;;  %v7690_v4 = vpack.c.bf16 (!%p267_p9), %v366_v1, %v365_v0  ;;  %v368_v5 = vld [vmem:[%s9105_s1 + $0x18] sm:$0xff] (!%p267_p9)  ;;  %v369_v7 = vld [vmem:[%s9105_s1 + $0x20] sm:$0xff] (!%p267_p9)  ;;  %v370_v8 = vld [vmem:[%s9105_s1 + $0x28] sm:$0xff] (!%p267_p9)  ;;  %v8022_v50 = vmov (!%p267_p9), 0.0|0.0  }
   0xf   : > { %v7694_v6 = vpack.c.bf16 (!%p267_p9), %v368_v5, %v367_v2  ;;  %v7698_v9 = vpack.c.bf16 (!%p267_p9), %v370_v8, %v369_v7  ;;  %v371_v10 = vld [vmem:[%s9105_s1 + $0x30] sm:$0xff] (!%p267_p9)  ;;  %v372_v13 = vld [vmem:[%s9105_s1 + $0x38] sm:$0xff] (!%p267_p9)  ;;  %v373_v17 = vld [vmem:[%s9105_s1 + $0x40] sm:$0xff] (!%p267_p9)  ;;  %v8198_v40 = vand.u32 (!%p267_p9), 127, %v315_v39  ;;  %v8023_v51 = vmov (!%p267_p9), 0.0   ;;  %s8025_s26 = smov (!%p267_p9), 96  }
  0x10   : > { %7691 = vmatprep.subr.bf16.mxu0 (!%p267_p9), %v7690_v4  ;;  %v7702_v16 = vpack.c.bf16 (!%p267_p9), %v372_v13, %v371_v10  ;;  %v374_v18 = vld [vmem:[%s9105_s1 + $0x48] sm:$0xff] (!%p267_p9)  ;;  %v375_v22 = vld [vmem:[%s9105_s1 + $0x50] sm:$0xff] (!%p267_p9)  ;;  %v376_v23 = vld [vmem:[%s9105_s1 + $0x58] sm:$0xff] (!%p267_p9)  ;;  %vm8024_vm8 = vmmov (!%p267_p9), 0   ;;  %vm490_vm9 = vcmask (!%p267_p9), 261120   ;;  %vm709_vm10 = vcmask (!%p267_p9), 64512  }
  0x11   : > { %7693 = vmatpush3.bf16.msra.mxu0 (!%p267_p9), %v7690_v4  ;;  %v7706_v21 = vpack.c.bf16 (!%p267_p9), %v374_v18, %v373_v17  ;;  %v7710_v26 = vpack.c.bf16 (!%p267_p9), %v376_v23, %v375_v22  ;;  %v377_v27 = vld [vmem:[%s9105_s1 + $0x60] sm:$0xff] (!%p267_p9)  ;;  %v378_v28 = vld [vmem:[%s9105_s1 + $0x68] sm:$0xff] (!%p267_p9)  ;;  %v379_v30 = vld [vmem:[%s9105_s1 + $0x70] sm:$0xff] (!%p267_p9)  ;;  %v703_v23 = vshrl.u32 (!%p267_p9), %v315_v39, 7  ;;  %s8028_s10 = smov (!%p267_p9), 88   ;;  %s8029_s12 = smov (!%p267_p9), 120  }
  0x12   : > { %7695 = vmatprep.subr.bf16.mxu0 (!%p267_p9), %v7694_v6  ;;  %v7714_v29 = vpack.c.bf16 (!%p267_p9), %v378_v28, %v377_v27  ;;  %v380_v31 = vld [vmem:[%s9105_s1 + $0x78] sm:$0xff] (!%p267_p9)  ;;  %v486_v32 = vld [vmem:[%s9107_s3] sm:$0xff] (!%p267_p9)  ;;  %v487_v33 = vld [vmem:[%s9107_s3 + $0x8] sm:$0xff] (!%p267_p9)  ;;  %s8030_s13 = smov (!%p267_p9), 56   ;;  %s8032_s19 = smov (!%p267_p9), 112  }
  0x13   : > { %v488_v34 = vld [vmem:[%s9107_s3 + $0x10] sm:$0xff] (!%p267_p9)  ;;  %v7718_v35 = vpack.c.bf16 (!%p267_p9), %v380_v31, %v379_v30  ;;  %v7722_v36 = vpack.c.bf16 (!%p267_p9), %v487_v33, %v486_v32  ;;  %v489_v37 = vld [vmem:[%s9107_s3 + $0x18] sm:$0xff] (!%p267_p9)  ;;  %v620_v60 = vld [vmem:[%s9106_s2] sm:$0xff] (!%p267_p9)  ;;  %vm704_vm11 = vcmp.ge.s32.totalorder (!%p267_p9), %v703_v23, %v8198_v40  ;;  %s8033_s20 = smov (!%p267_p9), 48   ;;  %s7001_s22 = sshll.u32 (!%p267_p9), %s8106_s9, 10 }
  0x14   : > { %v7726_v38 = vpack.c.bf16 (!%p267_p9), %v489_v37, %v488_v34 }
  0x15   : > { %s9120_s17 = smov (!%p301_p10, %s6831_s17), 15  ;;  %7697 = vmatpush3.bf16.msra.mxu0 %v7694_v6  ;;  %7723 = vmatprep.subr.bf16.mxu1 %v7722_v36 }
  0x16   : > { %s6832_s18 = sshll.u32 %s9120_s17, 3  ;;  %7699 = vmatprep.subr.bf16.mxu0 %v7698_v9  ;;  %7725 = vmatpush3.bf16.msra.mxu1 %v7722_v36  ;;  %s8034_s17 = smov 104  }
  0x17   : > { %s304_s21 = scalar_lea.vmem %s9104_s0, %s6832_s18  ;;  %7727 = vmatprep.subr.bf16.mxu1 %v7726_v38  ;;  %s8031_s18 = smov 80  }
  0x18   : > { %v309_v11 = vld [vmem:[%s304_s21 + $0x10] sm:$0xff]  ;;  %v307_v12 = vld [vmem:[%s304_s21] sm:$0xff]  ;;  %v310_v14 = vld [vmem:[%s304_s21 + $0x18] sm:$0xff] }
  0x19   : > { %324 = vperm.xlu1 %7827, %v309_v11   ;;  %318 = vperm.xlu0 %7826, %v307_v12   ;;  %v308_v15 = vld [vmem:[%s304_s21 + $0x8] sm:$0xff]  ;;  %v311_v20 = vld [vmem:[%s304_s21 + $0x20] sm:$0xff]  ;;  %v314_v24 = vld [vmem:[%s304_s21 + $0x38] sm:$0xff] }
  0x1a   : > { %v312_v19 = vld [vmem:[%s304_s21 + $0x28] sm:$0xff]  ;;  %7701 = vmatpush3.bf16.msra.mxu0 %v7698_v9  ;;  %v313_v25 = vld [vmem:[%s304_s21 + $0x30] sm:$0xff]  ;;  %7729 = vmatpush3.bf16.msra.mxu1 %v7726_v38  ;;  %s8027_s21 = smov 64  }
  0x1b   : > { %7703 = vmatprep.subr.bf16.mxu0 %v7702_v16  ;;  %7730 = vmatprep.subr.bf16.mxu1 %v8022_v50 }
  0x1d   : > { %327 = vperm.xlu1 %7827, %v310_v14   ;;  %321 = vperm.xlu0 %7826, %v308_v15  }
  0x1e   : > { %7705 = vmatpush3.bf16.msra.mxu0 %v7702_v16 }
  0x1f   : > { %7707 = vmatprep.subr.bf16.mxu0 %v7706_v21 }
  0x21   : > { %333 = vperm.xlu1 %7827, %v312_v19   ;;  %330 = vperm.xlu0 %7826, %v311_v20  }
  0x22   : > { %7709 = vmatpush3.bf16.msra.mxu0 %v7706_v21 }
  0x23   : > { %7711 = vmatprep.subr.bf16.mxu0 %v7710_v26 }
  0x25   : > { %339 = vperm.xlu1 %7827, %v314_v24   ;;  %336 = vperm.xlu0 %7826, %v313_v25  }
  0x26   : > { %7713 = vmatpush3.bf16.msra.mxu0 %v7710_v26 }
  0x27   : > { %7715 = vmatprep.subr.bf16.mxu0 %v7714_v29 }
  0x2a   : > { %7717 = vmatpush3.bf16.msra.mxu0 %v7714_v29  ;;  %v8026_v29 = vmov -1e+30  }
  0x2b   : > { %7719 = vmatprep.subr.bf16.mxu0 %v7718_v35  ;;  %v8304_v30 = vsel %vm704_vm11, 0.0, %v8026_v29 }
  0x2e   : > { %7721 = vmatpush3.bf16.msra.mxu0 %v7718_v35 }
  0x2f   : > { %7329 = vmatprep.subr.mxu0 %v8023_v51 }
  0x98   : > { %v325_v41 = vpop.permute.xlu1 %324  ;;  %v319_v42 = vpop.permute.xlu0 %318 }
  0x99   : > { %vm341_vm0 = vcmp.eq.s32.totalorder %v319_v42, %v8198_v40  ;;  %vm343_vm1 = vcmp.eq.s32.totalorder %v325_v41, %v8198_v40 }
  0x9a   : > { %7251 = vmatprep.mubr.msk.f32.mxu0 %vm341_vm0, %v8021_v43 }
  0x9c   : > { %v328_v44 = vpop.permute.xlu1 %327  ;;  %v322_v45 = vpop.permute.xlu0 %321 }
  0x9d   : > { %vm342_vm2 = vcmp.eq.s32.totalorder %v322_v45, %v8198_v40  ;;  %vm344_vm3 = vcmp.eq.s32.totalorder %v328_v44, %v8198_v40 }
  0x9e   : > { %7252 = vmatmul.mubr.msk.f32.vlgmr.msra.gmra.mrb[0].mxu0 %vm342_vm2, %v8021_v43 }
  0x9f   : > { %7254 = vmatprep.mubr.msk.f32.mxu0 %vm343_vm1, %v8021_v43 }
  0xa0   : > { %v334_v46 = vpop.permute.xlu1 %333  ;;  %v331_v47 = vpop.permute.xlu0 %330 }
  0xa1   : > { %vm345_vm4 = vcmp.eq.s32.totalorder %v331_v47, %v8198_v40  ;;  %vm346_vm5 = vcmp.eq.s32.totalorder %v334_v46, %v8198_v40 }
  0xa2   : > { %7255 = vmatmul.mubr.msk.f32.gmra.mrb[2].mxu0 %vm344_vm3, %v8021_v43 }
  0xa3   : > { %7257 = vmatprep.mubr.msk.f32.mxu0 %vm345_vm4, %v8021_v43 }
  0xa4   : > { %v337_v48 = vpop.permute.xlu0 %336  ;;  %v340_v49 = vpop.permute.xlu1 %339 }
  0xa5   : > { %vm347_vm6 = vcmp.eq.s32.totalorder %v337_v48, %v8198_v40  ;;  %vm348_vm7 = vcmp.eq.s32.totalorder %v340_v49, %v8198_v40 }
  0xa6   : > { %7258 = vmatmul.mubr.msk.f32.gmra.mrb[4].mxu0 %vm346_vm5, %v8021_v43 }
  0xa7   : > { %7260 = vmatprep.mubr.msk.f32.mxu0 %vm347_vm6, %v8021_v43 }
  0xaa   : > { %7261 = vmatmul.mubr.msk.f32.gmra.mrb[6].mxu0 %vm348_vm7, %v8021_v43 }
  0xab   : > { %7331 = vmatprep.mubr.msk.f32.mxu0 %vm8024_vm8, %v8023_v51 }
 0x171   : > { %v7253_v52 = vpop.f32.mrb[0].mxu0 }
 0x172   : > { %v447_v53 = vpop.f32.mrb[1].mxu0 }
 0x173   : > { %7271 = vmatprep.mubr.msk.f32.mxu1 %vm490_vm9, %v447_v53 }
 0x174   : > { %7272 = vmatmul.mubr.msk.f32.vlgmr.msra.gmra.mrb[0].mxu1 %vm490_vm9, %v7253_v52 }
 0x175   : > { %v7256_v54 = vpop.f32.mrb[2].mxu0  ;;  %7732 = vmatpush3.bf16.msra.mxu1 %v7722_v36 }
 0x176   : > { %v457_v55 = vpop.f32.mrb[3].mxu0  ;;  %7733 = vmatprep.subr.bf16.mxu1 %v8022_v50 }
 0x177   : > { %7274 = vmatprep.mubr.msk.f32.mxu1 %vm490_vm9, %v457_v55 }
 0x178   : > { %7275 = vmatmul.mubr.msk.f32.gmra.mrb[2].mxu1 %vm490_vm9, %v7256_v54 }
 0x179   : > { %v7259_v56 = vpop.f32.mrb[4].mxu0  ;;  %7735 = vmatpush3.bf16.msra.mxu1 %v7726_v38 }
 0x17a   : > { %v467_v57 = vpop.f32.mrb[5].mxu0  ;;  %7294 = vmatprep.subr.mxu1 %v8023_v51 }
 0x17b   : > { %7277 = vmatprep.mubr.msk.f32.mxu1 %vm490_vm9, %v467_v57 }
 0x17c   : > { %7278 = vmatmul.mubr.msk.f32.gmra.mrb[4].mxu1 %vm490_vm9, %v7259_v56 }
 0x17d   : > { %v7262_v58 = vpop.f32.mrb[6].mxu0 }
 0x17e   : > { %v477_v59 = vpop.f32.mrb[7].mxu0 }
 0x17f   : > { %7280 = vmatprep.mubr.msk.f32.mxu1 %vm490_vm9, %v477_v59 }
 0x180   : > { %7281 = vmatmul.mubr.msk.f32.gmra.mrb[6].mxu1 %vm490_vm9, %v7262_v58 }
 0x181   : > { %7291 = vmatprep.mubr.msk.f32.mxu1 %vm8024_vm8, %v8023_v51 }
 0x184   : > { %7292 = vmatmul.mubr.msk.f32.vlgmr.msra.gmra.mrb[8].mxu1 %vm490_vm9, %v620_v60 }
 0x185   : > { %7296 = vmatprep.mubr.msk.f32.mxu1 %vm8024_vm8, %v8023_v51 }
 0x247   : > { %v7273_v61 = vpop.f32.mrb[0].mxu1 }
 0x248   : > { %v581_v62 = vpop.f32.mrb[1].mxu1 }
 0x24b   : > { %v7276_v63 = vpop.f32.mrb[2].mxu1 }
 0x24c   : > { %v591_v0 = vpop.f32.mrb[3].mxu1 }
 0x24f   : > { %v7279_v1 = vpop.f32.mrb[4].mxu1 }
 0x250   : > { %v601_v2 = vpop.f32.mrb[5].mxu1 }
 0x253   : > { %v7282_v3 = vpop.f32.mrb[6].mxu1 }
 0x254   : > { %v611_v4 = vpop.f32.mrb[7].mxu1 }
 0x257   : > { %v690_v5 = vpop.f32.mrb[8].mxu1 }
 0x258   : > { %v8228_v6 = vadd.f32 %v690_v5, %v581_v62  ;;  %v8230_v7 = vadd.f32 %v7273_v61, %v690_v5  ;;  %v8232_v8 = vadd.f32 %v690_v5, %v591_v0  ;;  %v8234_v9 = vadd.f32 %v7276_v63, %v690_v5  ;;  %v7293_v10 = vpop.f32.mrb[9].mxu1 }
 0x259   : > { %v8236_v11 = vadd.f32 %v690_v5, %v601_v2  ;;  %v8238_v12 = vadd.f32 %v7279_v1, %v690_v5  ;;  %v8240_v13 = vadd.f32 %v690_v5, %v611_v4  ;;  %v8242_v14 = vadd.f32 %v7282_v3, %v690_v5 }
 0x25a   : > { %785 = vrot.lane.b32.xlu1 %v8230_v7, %s8025_s26  ;;  %707 = vrot.lane.b32.xlu0 %v8228_v6, %s8025_s26 }
 0x25e   : > { %939 = vrot.lane.b32.xlu1 %v8234_v9, %s8025_s26  ;;  %862 = vrot.lane.b32.xlu0 %v8232_v8, %s8025_s26 }
 0x262   : > { %1093 = vrot.lane.b32.xlu1 %v8238_v12, %s8025_s26  ;;  %1016 = vrot.lane.b32.xlu0 %v8236_v11, %s8025_s26 }
 0x266   : > { %1170 = vrot.lane.b32.xlu1 %v8240_v13, %s8025_s26  ;;  %1247 = vrot.lane.b32.xlu0 %v8242_v14, %s8025_s26  ;;  %s8035_s26 = smov 72  }
 0x2cc   : > { %v708_v15 = vpop.permute.xlu0 %707  ;;  %v786_v16 = vpop.permute.xlu1 %785 }
 0x2cd   : > { %7295 = vmatpush3.xpose.msk.msra.mxu1 %vm709_vm10, %v708_v15 }
 0x2ce   : > { %7299 = vmatprep.subr.mxu1 %v8023_v51 }
 0x2d0   : > { %7297 = vmatmul.mubr.msk.f32.vlgmr.msra.gmra.mrb[10].mxu1 %vm709_vm10, %v8228_v6  ;;  %v863_v17 = vpop.permute.xlu0 %862  ;;  %v940_v19 = vpop.permute.xlu1 %939 }
 0x2d1   : > { %7300 = vmatpush3.xpose.msk.msra.mxu1 %vm709_vm10, %v786_v16  ;;  %7301 = vmatprep.mubr.msk.f32.mxu1 %vm8024_vm8, %v8023_v51 }
 0x2d2   : > { %7304 = vmatprep.subr.mxu1 %v8023_v51 }
 0x2d4   : > { %7302 = vmatmul.mubr.msk.f32.vlgmr.msra.gmra.mrb[12].mxu1 %vm709_vm10, %v8230_v7  ;;  %v1017_v18 = vpop.permute.xlu0 %1016  ;;  %v1094_v21 = vpop.permute.xlu1 %1093 }
 0x2d5   : > { %7305 = vmatpush3.xpose.msk.msra.mxu1 %vm709_vm10, %v863_v17  ;;  %7306 = vmatprep.mubr.msk.f32.mxu1 %vm8024_vm8, %v8023_v51 }
 0x2d6   : > { %7309 = vmatprep.subr.mxu1 %v8023_v51 }
 0x2d8   : > { %7307 = vmatmul.mubr.msk.f32.vlgmr.msra.gmra.mrb[14].mxu1 %vm709_vm10, %v8232_v8  ;;  %v1248_v20 = vpop.permute.xlu0 %1247  ;;  %v1171_v22 = vpop.permute.xlu1 %1170 }
 0x2d9   : > { %7310 = vmatpush3.xpose.msk.msra.mxu1 %vm709_vm10, %v940_v19  ;;  %7330 = vmatpush3.xpose.msk.msra.mxu0 %vm709_vm10, %v1248_v20 }
 0x2da   : > { %7311 = vmatprep.mubr.msk.f32.mxu1 %vm8024_vm8, %v8023_v51  ;;  %7314 = vmatprep.subr.mxu1 %v8023_v51 }
 0x2db   : > { %7339 = vmatprep.subr.mxu0 %v8023_v51 }
 0x2dc   : > { %7312 = vmatmul.mubr.msk.f32.vlgmr.msra.gmra.mrb[16].mxu1 %vm709_vm10, %v8234_v9  ;;  %7332 = vmatmul.mubr.msk.f32.vlgmr.msra.gmra.mrb[8].mxu0 %vm709_vm10, %v8242_v14 }
 0x2dd   : > { %7315 = vmatpush3.xpose.msk.msra.mxu1 %vm709_vm10, %v1017_v18  ;;  %7316 = vmatprep.mubr.msk.f32.mxu1 %vm8024_vm8, %v8023_v51 }
 0x2de   : > { %7319 = vmatprep.subr.mxu1 %v8023_v51  ;;  %7341 = vmatprep.mubr.msk.f32.mxu0 %vm8024_vm8, %v8023_v51 }
 0x2e0   : > { %7317 = vmatmul.mubr.msk.f32.vlgmr.msra.gmra.mrb[18].mxu1 %vm709_vm10, %v8236_v11 }
 0x2e1   : > { %7320 = vmatpush3.xpose.msk.msra.mxu1 %vm709_vm10, %v1094_v21  ;;  %7321 = vmatprep.mubr.msk.f32.mxu1 %vm8024_vm8, %v8023_v51 }
 0x2e2   : > { %7324 = vmatprep.subr.mxu1 %v8023_v51 }
 0x2e4   : > { %7322 = vmatmul.mubr.msk.f32.vlgmr.msra.gmra.mrb[20].mxu1 %vm709_vm10, %v8238_v12 }
 0x2e5   : > { %7325 = vmatpush3.xpose.msk.msra.mxu1 %vm709_vm10, %v1171_v22  ;;  %7326 = vmatprep.mubr.msk.f32.mxu1 %vm8024_vm8, %v8023_v51 }
 0x2e6   : > { %7334 = vmatprep.subr.mxu1 %v8023_v51 }
 0x2e8   : > { %7327 = vmatmul.mubr.msk.f32.vlgmr.msra.gmra.mrb[22].mxu1 %vm709_vm10, %v8240_v13 }
 0x2e9   : > { %7336 = vmatprep.mubr.msk.f32.mxu1 %vm8024_vm8, %v8023_v51 }
 0x3a3   : > { %v8301_v24 = vpop.f32.mrb[10].mxu1 }
 0x3a4   : > { %v7298_v25 = vpop.f32.mrb[11].mxu1  ;;  %v1323_v20 = vmul.f32 0.35355338, %v8301_v24 }
 0x3a6   : > { %v8350_v22 = vadd.f32 %v1323_v20, %v8304_v30 }
 0x3a7   : > { %v857_v26 = vpop.f32.mrb[12].mxu1 }
 0x3a8   : > { %v1324_v27 = vmul.f32 0.35355338, %v857_v26  ;;  %v7303_v28 = vpop.f32.mrb[13].mxu1  ;;  %v1339_v25 = vsel %vm709_vm10, %v8350_v22, -inf }
 0x3aa   : > { %v1332_v31 = vadd.f32 %v1324_v27, %v8304_v30 }
 0x3ab   : > { %v8307_v32 = vpop.f32.mrb[14].mxu1 }
 0x3ac   : > { %v7308_v33 = vpop.f32.mrb[15].mxu1  ;;  %v1342_v34 = vsel %vm709_vm10, %v1332_v31, -inf  ;;  %v1325_v29 = vmul.f32 0.35355338, %v8307_v32 }
 0x3ad   : > { %1343 = vmax.xlane.f32.xlu0 %v1342_v34 }
 0x3af   : > { %v1011_v35 = vpop.f32.mrb[16].mxu1  ;;  %v1319_v36 = vpop.f32.mrb[8].mxu0 }
 0x3b0   : > { %v1326_v37 = vmul.f32 0.35355338, %v1011_v35  ;;  %v7313_v38 = vpop.f32.mrb[17].mxu1  ;;  %v7333_v39 = vpop.f32.mrb[9].mxu0  ;;  %v1330_v45 = vmul.f32 0.35355338, %v1319_v36 }
 0x3b2   : > { %v1334_v40 = vadd.f32 %v1326_v37, %v8304_v30  ;;  %v1338_v53 = vadd.f32 %v1330_v45, %v8304_v30 }
 0x3b3   : > { %v1088_v41 = vpop.f32.mrb[18].mxu1 }
 0x3b4   : > { %v7318_v42 = vpop.f32.mrb[19].mxu1  ;;  %v1348_v43 = vsel %vm709_vm10, %v1334_v40, -inf  ;;  %v1360_v54 = vsel %vm709_vm10, %v1338_v53, -inf  ;;  %v1327_v21 = vmul.f32 0.35355338, %v1088_v41 }
 0x3b5   : > { %1349 = vmax.xlane.f32.xlu1 %v1348_v43 }
 0x3b6   : > { %v8355_v26 = vadd.f32 %v1327_v21, %v8304_v30 }
 0x3b7   : > { %v1165_v44 = vpop.f32.mrb[20].mxu1 }
 0x3b8   : > { %v1328_v46 = vmul.f32 0.35355338, %v1165_v44  ;;  %v7323_v47 = vpop.f32.mrb[21].mxu1  ;;  %v1351_v27 = vsel %vm709_vm10, %v8355_v26, -inf }
 0x3ba   : > { %v1336_v48 = vadd.f32 %v1328_v46, %v8304_v30 }
 0x3bb   : > { %v1242_v49 = vpop.f32.mrb[22].mxu1 }
 0x3bc   : > { %v7328_v50 = vpop.f32.mrb[23].mxu1  ;;  %v1354_v52 = vsel %vm709_vm10, %v1336_v48, -inf  ;;  %v1329_v23 = vmul.f32 0.35355338, %v1242_v49 }
 0x3bd   : > { %1355 = vmax.xlane.f32.xlu0 %v1354_v52 }
 0x3be   : > { %v8360_v24 = vadd.f32 %v1329_v23, %v8304_v30 }
 0x3c0   : > { %v1357_v28 = vsel %vm709_vm10, %v8360_v24, -inf }
 0x3c1   : > { %1361 = vmax.xlane.f32.xlu0 %v1360_v54 }
 0x3c6   : > { %1503 = vrot.lane.b32.xlu1 %v8230_v7, %s8027_s21 }
 0x43a   : > { %v1344_v55 = vpop.xlane.xlu0 %1343 }
 0x43b   : > { %v1364_v56 = vsub.f32 %v1332_v31, %v1344_v55  ;;  %v8366_v31 = vadd.f32 %v1325_v29, %v8304_v30 }
 0x43d   : > { %v1373_v57 = vmul.f32 1.442695, %v1364_v56  ;;  %v1345_v33 = vsel %vm709_vm10, %v8366_v31, -inf }
 0x43f   : > { %7828 = vpow2.f32 %v1373_v57 }
 0x442   : > { %v1350_v58 = vpop.xlane.xlu1 %1349 }
 0x443   : > { %v1366_v63 = vsub.f32 %v1334_v40, %v1350_v58 }
 0x445   : > { %v1377_v2 = vmul.f32 1.442695, %v1366_v63 }
 0x446   : > { %v1504_v59 = vpop.permute.xlu1 %1503 }
 0x447   : > { %7340 = vmatpush3.msra.mxu0 %v1504_v59 }
 0x448   : > { %7349 = vmatprep.subr.mxu0 %v8023_v51 }
 0x449   : > { %v7829_v60 = vpop.eup %7828 }
 0x44a   : > { %v1356_v61 = vpop.xlane.xlu0 %1355  ;;  %v1390_v62 = vsel %vm709_vm10, %v7829_v60, 0.0 }
 0x44b   : > { %1391 = vadd.xlane.f32.xlu1 %v1390_v62  ;;  %v1368_v16 = vsub.f32 %v1336_v48, %v1356_v61 }
 0x44d   : > { %v1381_v17 = vmul.f32 1.442695, %v1368_v16 }
 0x44e   : > { %v1362_v0 = vpop.xlane.xlu0 %1361 }
 0x44f   : > { %v1370_v1 = vsub.f32 %v1338_v53, %v1362_v0 }
 0x451   : > { %v1385_v3 = vmul.f32 1.442695, %v1370_v1 }
 0x453   : > { %7830 = vpow2.f32 %v1385_v3 }
 0x454   : > { %7832 = vpow2.f32 %v1377_v2 }
 0x455   : > { %7834 = vpow2.f32 %v1381_v17 }
 0x45c   : > { %1807 = vrot.lane.b32.xlu1 %v8238_v12, %s8027_s21 }
 0x45d   : > { %v8322_v4 = vpop.eup %7830 }
 0x45e   : > { %v1408_v5 = vsel %vm709_vm10, %v8322_v4, 0.0  ;;  %v7833_v10 = vpop.eup %7832 }
 0x45f   : > { %1409 = vadd.xlane.f32.xlu0 %v1408_v5  ;;  %v1396_v15 = vsel %vm709_vm10, %v7833_v10, 0.0  ;;  %v7835_v18 = vpop.eup %7834 }
 0x460   : > { %v1402_v19 = vsel %vm709_vm10, %v7835_v18, 0.0 }
 0x463   : > { %1397 = vadd.xlane.f32.xlu0 %v1396_v15 }
 0x479   : > { %1655 = vrot.lane.b32.xlu0 %v8234_v9, %s8027_s21 }
 0x47d   : > { %2116 = vrot.lane.b32.xlu0 %v8230_v7, %s8028_s10 }
 0x480   : > { %1403 = vadd.xlane.f32.xlu1 %v1402_v19 }
 0x481   : > { %2272 = vrot.lane.b32.xlu0 %v8234_v9, %s8028_s10 }
 0x485   : > { %2428 = vrot.lane.b32.xlu0 %v8238_v12, %s8028_s10 }
 0x489   : > { %2584 = vrot.lane.b32.xlu0 %v8242_v14, %s8028_s10 }
 0x491   : > { %1959 = vrot.lane.b32.xlu1 %v8242_v14, %s8027_s21 }
 0x495   : > { %2114 = vrot.lane.b32.xlu1 %v8230_v7, %s8029_s12 }
 0x499   : > { %2270 = vrot.lane.b32.xlu1 %v8234_v9, %s8029_s12 }
 0x49d   : > { %2426 = vrot.lane.b32.xlu1 %v8238_v12, %s8029_s12 }
 0x4a1   : > { %2582 = vrot.lane.b32.xlu1 %v8242_v14, %s8029_s12 }
 0x4a8   : > { %1340 = vmax.xlane.f32.xlu0 %v1339_v25 }
 0x4ac   : > { %1352 = vmax.xlane.f32.xlu0 %v1351_v27 }
 0x4b0   : > { %1358 = vmax.xlane.f32.xlu0 %v1357_v28 }
 0x4c5   : > { %1346 = vmax.xlane.f32.xlu1 %v1345_v33 }
 0x4d8   : > { %v1392_v34 = vpop.xlane.xlu1 %1391 }
 0x4d9   : > { %7836 = vrcp.f32 %v1392_v34 }
 0x4dc   : > { %v1808_v41 = vpop.permute.xlu1 %1807 }
 0x4e3   : > { %v7837_v35 = vpop.eup %7836 }
 0x4e4   : > { %v1414_v36 = vmul.f32 %v7837_v35, %v7829_v60 }
 0x4e6   : > { %7342 = vmatmul.mubr.msk.f32.vlgmr.msra.gmra.mrb[10].mxu0 %vm709_vm10, %v1414_v36 }
 0x4e7   : > { %7351 = vmatprep.mubr.msk.f32.mxu0 %vm8024_vm8, %v8023_v51 }
 0x4ec   : > { %v1410_v37 = vpop.xlane.xlu0 %1409 }
 0x4f0   : > { %v1398_v38 = vpop.xlane.xlu0 %1397 }
 0x4f1   : > { %7838 = vrcp.f32 %v1398_v38 }
 0x4f4   : > { %v1656_v32 = vpop.permute.xlu0 %1655 }
 0x4f5   : > { %7350 = vmatpush3.msra.mxu0 %v1656_v32 }
 0x4f6   : > { %7359 = vmatprep.subr.mxu0 %v8023_v51 }
 0x4f8   : > { %v2117_v47 = vpop.permute.xlu0 %2116 }
 0x4fb   : > { %v7839_v39 = vpop.eup %7838 }
 0x4fc   : > { %v1418_v40 = vmul.f32 %v7839_v39, %v7833_v10  ;;  %v2273_v50 = vpop.permute.xlu0 %2272 }
 0x4fe   : > { %7352 = vmatmul.mubr.msk.f32.vlgmr.msra.gmra.mrb[12].mxu0 %vm709_vm10, %v1418_v40 }
 0x4ff   : > { %7360 = vmatpush3.msra.mxu0 %v1808_v41  ;;  %7361 = vmatprep.mubr.msk.f32.mxu0 %vm8024_vm8, %v8023_v51 }
 0x500   : > { %7369 = vmatprep.subr.mxu0 %v8023_v51  ;;  %v2429_v53 = vpop.permute.xlu0 %2428 }
 0x504   : > { %v2585_v55 = vpop.permute.xlu0 %2584 }
 0x50d   : > { %v1404_v42 = vpop.xlane.xlu1 %1403 }
 0x50e   : > { %7840 = vrcp.f32 %v1404_v42 }
 0x50f   : > { %7842 = vrcp.f32 %v1410_v37 }
 0x511   : > { %v1960_v44 = vpop.permute.xlu1 %1959 }
 0x515   : > { %v2115_v49 = vpop.permute.xlu1 %2114 }
 0x518   : > { %v7841_v43 = vpop.eup %7840 }
 0x519   : > { %v1422_v45 = vmul.f32 %v7841_v43, %v7835_v18  ;;  %v7843_v46 = vpop.eup %7842  ;;  %v2271_v52 = vpop.permute.xlu1 %2270 }
 0x51a   : > { %v1426_v48 = vmul.f32 %v7843_v46, %v8322_v4 }
 0x51b   : > { %7362 = vmatmul.mubr.msk.f32.vlgmr.msra.gmra.mrb[14].mxu0 %vm709_vm10, %v1422_v45 }
 0x51c   : > { %7370 = vmatpush3.msra.mxu0 %v1960_v44  ;;  %7371 = vmatprep.mubr.msk.f32.mxu0 %vm8024_vm8, %v8023_v51 }
 0x51d   : > { %7379 = vmatprep.subr.mxu0 %v8023_v51  ;;  %v2427_v54 = vpop.permute.xlu1 %2426 }
 0x51f   : > { %7372 = vmatmul.mubr.msk.f32.vlgmr.msra.gmra.mrb[16].mxu0 %vm709_vm10, %v1426_v48 }
 0x520   : > { %7381 = vmatprep.mubr.msk.f32.mxu0 %vm8024_vm8, %v8023_v51 }
 0x521   : > { %v2583_v56 = vpop.permute.xlu1 %2582 }
 0x523   : > { %7380 = vmatpush3.xpose.msk.msra.mxu0 %vm709_vm10, %v2117_v47 }
 0x524   : > { %7389 = vmatprep.subr.mxu0 %v8023_v51 }
 0x526   : > { %7382 = vmatmul.mubr.msk.f32.vlgmr.msra.gmra.mrb[18].mxu0 %vm709_vm10, %v2115_v49 }
 0x527   : > { %7390 = vmatpush3.xpose.msk.msra.mxu0 %vm709_vm10, %v2273_v50  ;;  %7391 = vmatprep.mubr.msk.f32.mxu0 %vm8024_vm8, %v8023_v51 }
 0x528   : > { %7399 = vmatprep.subr.mxu0 %v8023_v51 }
 0x52a   : > { %7392 = vmatmul.mubr.msk.f32.vlgmr.msra.gmra.mrb[20].mxu0 %vm709_vm10, %v2271_v52 }
 0x52b   : > { %7400 = vmatpush3.xpose.msk.msra.mxu0 %vm709_vm10, %v2429_v53  ;;  %7401 = vmatprep.mubr.msk.f32.mxu0 %vm8024_vm8, %v8023_v51 }
 0x52c   : > { %7409 = vmatprep.subr.mxu0 %v8023_v51 }
 0x52e   : > { %7402 = vmatmul.mubr.msk.f32.vlgmr.msra.gmra.mrb[22].mxu0 %vm709_vm10, %v2427_v54 }
 0x52f   : > { %7410 = vmatpush3.xpose.msk.msra.mxu0 %vm709_vm10, %v2585_v55  ;;  %7411 = vmatprep.mubr.msk.f32.mxu0 %vm8024_vm8, %v8023_v51 }
 0x530   : > { %7419 = vmatprep.subr.mxu0 %v8023_v51 }
 0x532   : > { %7412 = vmatmul.mubr.msk.f32.vlgmr.msra.gmra.mrb[24].mxu0 %vm709_vm10, %v2583_v56 }
 0x533   : > { %7421 = vmatprep.mubr.msk.f32.mxu0 %vm8024_vm8, %v8023_v51 }
 0x535   : > { %v1341_v57 = vpop.xlane.xlu0 %1340 }
 0x536   : > { %v1363_v58 = vsub.f32 %v8350_v22, %v1341_v57 }
 0x538   : > { %v1371_v59 = vmul.f32 1.442695, %v1363_v58 }
 0x539   : > { %v1353_v60 = vpop.xlane.xlu0 %1352 }
 0x53a   : > { %7844 = vpow2.f32 %v1371_v59  ;;  %v1367_v61 = vsub.f32 %v8355_v26, %v1353_v60 }
 0x53c   : > { %v1379_v62 = vmul.f32 1.442695, %v1367_v61 }
 0x53d   : > { %v1359_v16 = vpop.xlane.xlu0 %1358 }
 0x53e   : > { %7846 = vpow2.f32 %v1379_v62  ;;  %v1369_v17 = vsub.f32 %v8360_v24, %v1359_v16 }
 0x540   : > { %v1383_v18 = vmul.f32 1.442695, %v1369_v17 }
 0x544   : > { %v7845_v63 = vpop.eup %7844 }
 0x545   : > { %v1387_v0 = vsel %vm709_vm10, %v7845_v63, 0.0 }
 0x546   : > { %1388 = vadd.xlane.f32.xlu1 %v1387_v0 }
 0x548   : > { %v8409_v1 = vpop.eup %7846 }
 0x549   : > { %v1399_v2 = vsel %vm709_vm10, %v8409_v1, 0.0 }
 0x54a   : > { %1400 = vadd.xlane.f32.xlu1 %v1399_v2 }
 0x552   : > { %v1347_v3 = vpop.xlane.xlu1 %1346 }
 0x553   : > { %v1365_v4 = vsub.f32 %v8366_v31, %v1347_v3 }
 0x555   : > { %v1375_v5 = vmul.f32 1.442695, %v1365_v4 }
 0x557   : > { %7848 = vpow2.f32 %v1375_v5 }
 0x558   : > { %7850 = vpow2.f32 %v1383_v18 }
 0x55b   : > { %1427 = vrot.lane.b32.xlu1 %v8228_v6, %s8027_s21 }
 0x55f   : > { %1731 = vrot.lane.b32.xlu1 %v8236_v11, %s8027_s21 }
 0x561   : > { %v7849_v10 = vpop.eup %7848 }
 0x562   : > { %v1393_v15 = vsel %vm709_vm10, %v7849_v10, 0.0  ;;  %v8432_v19 = vpop.eup %7850 }
 0x563   : > { %1883 = vrot.lane.b32.xlu1 %v8240_v13, %s8027_s21  ;;  %1394 = vadd.xlane.f32.xlu0 %v1393_v15  ;;  %v1405_v20 = vsel %vm709_vm10, %v8432_v19, 0.0 }
 0x567   : > { %2036 = vrot.lane.b32.xlu1 %v8228_v6, %s8029_s12 }
 0x56b   : > { %2192 = vrot.lane.b32.xlu1 %v8232_v8, %s8029_s12 }
 0x56f   : > { %2348 = vrot.lane.b32.xlu1 %v8236_v11, %s8029_s12 }
 0x573   : > { %2504 = vrot.lane.b32.xlu1 %v8240_v13, %s8029_s12  ;;  %s8036_s12 = smov 40  }
 0x579   : > { %1579 = vrot.lane.b32.xlu0 %v8232_v8, %s8027_s21  ;;  %s8037_s21 = smov [#allocation2]  }
 0x598   : > { %1406 = vadd.xlane.f32.xlu0 %v1405_v20 }
 0x5ae   : > { %2038 = vrot.lane.b32.xlu0 %v8228_v6, %s8028_s10 }
 0x5b2   : > { %2194 = vrot.lane.b32.xlu0 %v8232_v8, %s8028_s10 }
 0x5b6   : > { %2350 = vrot.lane.b32.xlu0 %v8236_v11, %s8028_s10 }
 0x5b9   : > { %v8442_v21 = vpop.f32.mrb[10].mxu0 }
 0x5ba   : > { %v7343_v22 = vpop.f32.mrb[11].mxu0  ;;  %2506 = vrot.lane.b32.xlu0 %v8240_v13, %s8028_s10  ;;  %s7960_s10 = sshll.u32 %s8037_s21, 4  ;;  %s7961_s10 = int_to_ptr.vmem [resolvable:$false] %s7960_s10 }
 0x5d1   : > { %v8446_v23 = vpop.f32.mrb[12].mxu0 }
 0x5d2   : > { %v7353_v25 = vpop.f32.mrb[13].mxu0 }
 0x5d3   : > { %v1389_v26 = vpop.xlane.xlu1 %1388 }
 0x5d4   : > { %7852 = vrcp.f32 %v1389_v26 }
 0x5d7   : > { %v1401_v27 = vpop.xlane.xlu1 %1400 }
 0x5db   : > { %v1428_v24 = vpop.permute.xlu1 %1427 }
 0x5dc   : > { %7335 = vmatpush3.msra.mxu1 %v1428_v24 }
 0x5dd   : > { %7344 = vmatprep.subr.mxu1 %v8023_v51 }
 0x5de   : > { %v7853_v28 = vpop.eup %7852 }
 0x5df   : > { %v1412_v29 = vmul.f32 %v7853_v28, %v7845_v63  ;;  %v1732_v41 = vpop.permute.xlu1 %1731 }
 0x5e1   : > { %7337 = vmatmul.mubr.msk.f32.vlgmr.msra.gmra.mrb[24].mxu1 %vm709_vm10, %v1412_v29 }
 0x5e2   : > { %7346 = vmatprep.mubr.msk.f32.mxu1 %vm8024_vm8, %v8023_v51 }
 0x5e3   : > { %v1884_v53 = vpop.permute.xlu1 %1883 }
 0x5e7   : > { %v2037_v3 = vpop.permute.xlu1 %2036 }
 0x5ee   : > { %v8452_v31 = vpop.f32.mrb[14].mxu0 }
 0x5ef   : > { %v7363_v33 = vpop.f32.mrb[15].mxu0 }
 0x5f0   : > { %v1395_v34 = vpop.xlane.xlu0 %1394 }
 0x5f1   : > { %7854 = vrcp.f32 %v1395_v34 }
 0x5f2   : > { %v8454_v35 = vpop.f32.mrb[16].mxu0  ;;  %7856 = vrcp.f32 %v1401_v27 }
 0x5f3   : > { %v7373_v36 = vpop.f32.mrb[17].mxu0 }
 0x5f4   : > { %v1580_v37 = vpop.permute.xlu0 %1579 }
 0x5f5   : > { %7345 = vmatpush3.msra.mxu1 %v1580_v37 }
 0x5f6   : > { %7354 = vmatprep.subr.mxu1 %v8023_v51 }
 0x5f9   : > { %v2188_v38 = vpop.f32.mrb[18].mxu0 }
 0x5fa   : > { %v2661_v32 = vmul.f32 0.35355338, %v2188_v38  ;;  %v7383_v39 = vpop.f32.mrb[19].mxu0 }
 0x5fb   : > { %v7855_v40 = vpop.eup %7854 }
 0x5fc   : > { %v8458_v42 = vadd.f32 %v2661_v32, %v8304_v30  ;;  %v1416_v43 = vmul.f32 %v7855_v40, %v7849_v10  ;;  %v7857_v44 = vpop.eup %7856  ;;  %v2193_v10 = vpop.permute.xlu1 %2192 }
 0x5fd   : > { %v2344_v45 = vpop.f32.mrb[20].mxu0  ;;  %v1420_v50 = vmul.f32 %v7857_v44, %v8409_v1 }
 0x5fe   : > { %v2663_v46 = vmul.f32 0.35355338, %v2344_v45  ;;  %v7393_v47 = vpop.f32.mrb[21].mxu0  ;;  %v2679_v48 = vsel %vm709_vm10, %v8458_v42, -inf  ;;  %7347 = vmatmul.mubr.msk.f32.vlgmr.msra.gmra.mrb[26].mxu1 %vm709_vm10, %v1416_v43 }
 0x5ff   : > { %2680 = vmax.xlane.f32.xlu0 %v2679_v48  ;;  %7355 = vmatpush3.msra.mxu1 %v1732_v41 }
 0x600   : > { %7356 = vmatprep.mubr.msk.f32.mxu1 %vm8024_vm8, %v8023_v51  ;;  %7364 = vmatprep.subr.mxu1 %v8023_v51  ;;  %v2671_v49 = vadd.f32 %v2663_v46, %v8304_v30  ;;  %v2349_v16 = vpop.permute.xlu1 %2348 }
 0x601   : > { %v2500_v52 = vpop.f32.mrb[22].mxu0 }
 0x602   : > { %v2665_v54 = vmul.f32 0.35355338, %v2500_v52  ;;  %v7403_v55 = vpop.f32.mrb[23].mxu0  ;;  %v2685_v56 = vsel %vm709_vm10, %v2671_v49, -inf  ;;  %7357 = vmatmul.mubr.msk.f32.vlgmr.msra.gmra.mrb[28].mxu1 %vm709_vm10, %v1420_v50 }
 0x603   : > { %2686 = vmax.xlane.f32.xlu1 %v2685_v56  ;;  %7365 = vmatpush3.msra.mxu1 %v1884_v53 }
 0x604   : > { %v2673_v57 = vadd.f32 %v2665_v54, %v8304_v30  ;;  %7366 = vmatprep.mubr.msk.f32.mxu1 %vm8024_vm8, %v8023_v51  ;;  %7374 = vmatprep.subr.mxu1 %v8023_v51  ;;  %v2505_v18 = vpop.permute.xlu1 %2504 }
 0x605   : > { %v2656_v58 = vpop.f32.mrb[24].mxu0 }
 0x606   : > { %v2667_v59 = vmul.f32 0.35355338, %v2656_v58  ;;  %v7413_v60 = vpop.f32.mrb[25].mxu0  ;;  %v2691_v61 = vsel %vm709_vm10, %v2673_v57, -inf }
 0x607   : > { %2692 = vmax.xlane.f32.xlu0 %v2691_v61 }
 0x608   : > { %v8476_v62 = vadd.f32 %v2667_v59, %v8304_v30 }
 0x60a   : > { %v2697_v63 = vsel %vm709_vm10, %v8476_v62, -inf }
 0x60b   : > { %2698 = vmax.xlane.f32.xlu0 %v2697_v63 }
 0x614   : > { %2840 = vrot.lane.b32.xlu1 %v8230_v7, %s8030_s13 }
 0x618   : > { %3144 = vrot.lane.b32.xlu1 %v8238_v12, %s8030_s13 }
 0x621   : > { %2992 = vrot.lane.b32.xlu0 %v8234_v9, %s8030_s13 }
 0x625   : > { %v1407_v0 = vpop.xlane.xlu0 %1406 }
 0x626   : > { %7858 = vrcp.f32 %v1407_v0 }
 0x629   : > { %v2039_v1 = vpop.permute.xlu0 %2038 }
 0x62d   : > { %v2195_v5 = vpop.permute.xlu0 %2194 }
 0x630   : > { %v7859_v2 = vpop.eup %7858 }
 0x631   : > { %v1424_v4 = vmul.f32 %v7859_v2, %v8432_v19  ;;  %v2351_v15 = vpop.permute.xlu0 %2350 }
 0x633   : > { %7367 = vmatmul.mubr.msk.f32.vlgmr.msra.gmra.mrb[30].mxu1 %vm709_vm10, %v1424_v4 }
 0x634   : > { %7375 = vmatpush3.xpose.msk.msra.mxu1 %vm709_vm10, %v2039_v1  ;;  %7376 = vmatprep.mubr.msk.f32.mxu1 %vm8024_vm8, %v8023_v51 }
 0x635   : > { %7384 = vmatprep.subr.mxu1 %v8023_v51  ;;  %v2507_v17 = vpop.permute.xlu0 %2506 }
 0x637   : > { %7377 = vmatmul.mubr.msk.f32.vlgmr.msra.gmra.mrb[32].mxu1 %vm709_vm10, %v2037_v3 }
 0x638   : > { %7385 = vmatpush3.xpose.msk.msra.mxu1 %vm709_vm10, %v2195_v5  ;;  %7386 = vmatprep.mubr.msk.f32.mxu1 %vm8024_vm8, %v8023_v51 }
 0x639   : > { %7394 = vmatprep.subr.mxu1 %v8023_v51 }
 0x63b   : > { %7387 = vmatmul.mubr.msk.f32.vlgmr.msra.gmra.mrb[34].mxu1 %vm709_vm10, %v2193_v10 }
 0x63c   : > { %7395 = vmatpush3.xpose.msk.msra.mxu1 %vm709_vm10, %v2351_v15  ;;  %7396 = vmatprep.mubr.msk.f32.mxu1 %vm8024_vm8, %v8023_v51 }
 0x63d   : > { %7404 = vmatprep.subr.mxu1 %v8023_v51 }
 0x63f   : > { %7397 = vmatmul.mubr.msk.f32.vlgmr.msra.gmra.mrb[36].mxu1 %vm709_vm10, %v2349_v16 }
 0x640   : > { %7405 = vmatpush3.xpose.msk.msra.mxu1 %vm709_vm10, %v2507_v17  ;;  %7406 = vmatprep.mubr.msk.f32.mxu1 %vm8024_vm8, %v8023_v51 }
 0x641   : > { %7414 = vmatprep.subr.mxu1 %v8023_v51 }
 0x643   : > { %7407 = vmatmul.mubr.msk.f32.vlgmr.msra.gmra.mrb[38].mxu1 %vm709_vm10, %v2505_v18 }
 0x644   : > { %7416 = vmatprep.mubr.msk.f32.mxu1 %vm8024_vm8, %v8023_v51 }
 0x68c   : > { %v2681_v19 = vpop.xlane.xlu0 %2680 }
 0x68d   : > { %v2701_v20 = vsub.f32 %v8458_v42, %v2681_v19 }
 0x68f   : > { %v2710_v22 = vmul.f32 1.442695, %v2701_v20 }
 0x690   : > { %v2687_v25 = vpop.xlane.xlu1 %2686 }
 0x691   : > { %7860 = vpow2.f32 %v2710_v22  ;;  %v2703_v26 = vsub.f32 %v2671_v49, %v2687_v25 }
 0x693   : > { %v2714_v27 = vmul.f32 1.442695, %v2703_v26 }
 0x694   : > { %v2841_v24 = vpop.permute.xlu1 %2840  ;;  %v2693_v28 = vpop.xlane.xlu0 %2692 }
 0x695   : > { %7862 = vpow2.f32 %v2714_v27  ;;  %v2705_v29 = vsub.f32 %v2673_v57, %v2693_v28  ;;  %7420 = vmatpush3.msra.mxu0 %v2841_v24 }
 0x696   : > { %7429 = vmatprep.subr.mxu0 %v8023_v51 }
 0x697   : > { %v2718_v33 = vmul.f32 1.442695, %v2705_v29 }
 0x698   : > { %v2699_v42 = vpop.xlane.xlu0 %2698  ;;  %v3145_v15 = vpop.permute.xlu1 %3144 }
 0x699   : > { %7864 = vpow2.f32 %v2718_v33  ;;  %v2707_v43 = vsub.f32 %v8476_v62, %v2699_v42 }
 0x69b   : > { %v8512_v34 = vpop.eup %7860  ;;  %v2722_v44 = vmul.f32 1.442695, %v2707_v43 }
 0x69c   : > { %v2727_v36 = vsel %vm709_vm10, %v8512_v34, 0.0  ;;  %v2993_v18 = vpop.permute.xlu0 %2992 }
 0x69d   : > { %2728 = vadd.xlane.f32.xlu1 %v2727_v36  ;;  %7866 = vpow2.f32 %v2722_v44 }
 0x69f   : > { %v8516_v37 = vpop.eup %7862 }
 0x6a0   : > { %v2733_v38 = vsel %vm709_vm10, %v8516_v37, 0.0 }
 0x6a1   : > { %2734 = vadd.xlane.f32.xlu0 %v2733_v38 }
 0x6a3   : > { %v8520_v32 = vpop.eup %7864 }
 0x6a4   : > { %v2739_v39 = vsel %vm709_vm10, %v8520_v32, 0.0 }
 0x6a5   : > { %2740 = vadd.xlane.f32.xlu1 %v2739_v39 }
 0x6a7   : > { %v8538_v46 = vpop.eup %7866 }
 0x6a8   : > { %v2745_v48 = vsel %vm709_vm10, %v8538_v46, 0.0 }
 0x6b4   : > { %v8524_v40 = vpop.f32.mrb[24].mxu1 }
 0x6b5   : > { %v7338_v41 = vpop.f32.mrb[25].mxu1 }
 0x6b6   : > { %3296 = vrot.lane.b32.xlu1 %v8242_v14, %s8030_s13 }
 0x6b7   : > { %3633 = vrot.lane.b32.xlu0 %v8228_v6, %s8031_s18 }
 0x6ba   : > { %3631 = vrot.lane.b32.xlu1 %v8228_v6, %s8032_s19 }
 0x6be   : > { %3709 = vrot.lane.b32.xlu1 %v8230_v7, %s8032_s19 }
 0x6c2   : > { %3787 = vrot.lane.b32.xlu1 %v8232_v8, %s8032_s19 }
 0x6c6   : > { %3865 = vrot.lane.b32.xlu1 %v8234_v9, %s8032_s19 }
 0x6ca   : > { %3943 = vrot.lane.b32.xlu1 %v8236_v11, %s8032_s19 }
 0x6ce   : > { %4021 = vrot.lane.b32.xlu1 %v8238_v12, %s8032_s19 }
 0x6d1   : > { %v8536_v45 = vpop.f32.mrb[26].mxu1 }
 0x6d2   : > { %4099 = vrot.lane.b32.xlu1 %v8240_v13, %s8032_s19  ;;  %v7348_v47 = vpop.f32.mrb[27].mxu1 }
 0x6d5   : > { %v8543_v49 = vpop.f32.mrb[28].mxu1 }
 0x6d6   : > { %4177 = vrot.lane.b32.xlu1 %v8242_v14, %s8032_s19  ;;  %2746 = vadd.xlane.f32.xlu0 %v2745_v48  ;;  %v7358_v50 = vpop.f32.mrb[29].mxu1 }
 0x6ec   : > { %3711 = vrot.lane.b32.xlu0 %v8230_v7, %s8031_s18 }
 0x6f0   : > { %3789 = vrot.lane.b32.xlu0 %v8232_v8, %s8031_s18 }
 0x6f4   : > { %3867 = vrot.lane.b32.xlu0 %v8234_v9, %s8031_s18 }
 0x6f8   : > { %3945 = vrot.lane.b32.xlu0 %v8236_v11, %s8031_s18 }
 0x6fc   : > { %4023 = vrot.lane.b32.xlu0 %v8238_v12, %s8031_s18 }
 0x700   : > { %4101 = vrot.lane.b32.xlu0 %v8240_v13, %s8031_s18 }
 0x704   : > { %4179 = vrot.lane.b32.xlu0 %v8242_v14, %s8031_s18 }
 0x706   : > { %v8553_v52 = vpop.f32.mrb[30].mxu1 }
 0x707   : > { %v7368_v53 = vpop.f32.mrb[31].mxu1 }
 0x70a   : > { %v2110_v54 = vpop.f32.mrb[32].mxu1 }
 0x70b   : > { %v7378_v55 = vpop.f32.mrb[33].mxu1  ;;  %v2660_v1 = vmul.f32 0.35355338, %v2110_v54 }
 0x70d   : > { %v8561_v3 = vadd.f32 %v2660_v1, %v8304_v30 }
 0x70e   : > { %v2266_v56 = vpop.f32.mrb[34].mxu1 }
 0x70f   : > { %v2662_v57 = vmul.f32 0.35355338, %v2266_v56  ;;  %v7388_v58 = vpop.f32.mrb[35].mxu1  ;;  %v2676_v5 = vsel %vm709_vm10, %v8561_v3, -inf }
 0x711   : > { %v8556_v59 = vadd.f32 %v2662_v57, %v8304_v30 }
 0x712   : > { %v2422_v60 = vpop.f32.mrb[36].mxu1 }
 0x713   : > { %v7398_v61 = vpop.f32.mrb[37].mxu1  ;;  %v2682_v62 = vsel %vm709_vm10, %v8556_v59, -inf  ;;  %v2664_v2 = vmul.f32 0.35355338, %v2422_v60 }
 0x714   : > { %2683 = vmax.xlane.f32.xlu1 %v2682_v62 }
 0x715   : > { %v8566_v10 = vadd.f32 %v2664_v2, %v8304_v30 }
 0x716   : > { %v2578_v63 = vpop.f32.mrb[38].mxu1 }
 0x717   : > { %v7408_v0 = vpop.f32.mrb[39].mxu1  ;;  %v2666_v4 = vmul.f32 0.35355338, %v2578_v63  ;;  %v2688_v16 = vsel %vm709_vm10, %v8566_v10, -inf }
 0x719   : > { %v8571_v17 = vadd.f32 %v2666_v4, %v8304_v30 }
 0x71b   : > { %v2694_v20 = vsel %vm709_vm10, %v8571_v17, -inf }
 0x723   : > { %2677 = vmax.xlane.f32.xlu0 %v2676_v5 }
 0x727   : > { %2689 = vmax.xlane.f32.xlu0 %v2688_v16 }
 0x72a   : > { %v2729_v19 = vpop.xlane.xlu1 %2728 }
 0x72b   : > { %7868 = vrcp.f32 %v2729_v19  ;;  %2695 = vmax.xlane.f32.xlu0 %v2694_v20 }
 0x72e   : > { %v2735_v22 = vpop.xlane.xlu0 %2734 }
 0x72f   : > { %7870 = vrcp.f32 %v2735_v22 }
 0x732   : > { %v2741_v25 = vpop.xlane.xlu1 %2740  ;;  %v3634_v36 = vpop.permute.xlu0 %3633 }
 0x733   : > { %7872 = vrcp.f32 %v2741_v25 }
 0x735   : > { %v7869_v26 = vpop.eup %7868 }
 0x736   : > { %v2751_v27 = vmul.f32 %v7869_v26, %v8512_v34  ;;  %v3297_v34 = vpop.permute.xlu1 %3296 }
 0x738   : > { %7422 = vmatmul.mubr.msk.f32.vlgmr.msra.gmra.mrb[26].mxu0 %vm709_vm10, %v2751_v27 }
 0x739   : > { %v7871_v24 = vpop.eup %7870  ;;  %7430 = vmatpush3.msra.mxu0 %v2993_v18  ;;  %7431 = vmatprep.mubr.msk.f32.mxu0 %vm8024_vm8, %v8023_v51 }
 0x73a   : > { %v2755_v28 = vmul.f32 %v7871_v24, %v8516_v37  ;;  %7439 = vmatprep.subr.mxu0 %v8023_v51  ;;  %v3632_v38 = vpop.permute.xlu1 %3631 }
 0x73c   : > { %7432 = vmatmul.mubr.msk.f32.vlgmr.msra.gmra.mrb[28].mxu0 %vm709_vm10, %v2755_v28 }
 0x73d   : > { %v7873_v29 = vpop.eup %7872  ;;  %7440 = vmatpush3.msra.mxu0 %v3145_v15  ;;  %7441 = vmatprep.mubr.msk.f32.mxu0 %vm8024_vm8, %v8023_v51 }
 0x73e   : > { %v2759_v33 = vmul.f32 %v7873_v29, %v8520_v32  ;;  %7449 = vmatprep.subr.mxu0 %v8023_v51  ;;  %v3710_v41 = vpop.permute.xlu1 %3709 }
 0x740   : > { %7442 = vmatmul.mubr.msk.f32.vlgmr.msra.gmra.mrb[30].mxu0 %vm709_vm10, %v2759_v33 }
 0x741   : > { %7450 = vmatpush3.msra.mxu0 %v3297_v34  ;;  %7451 = vmatprep.mubr.msk.f32.mxu0 %vm8024_vm8, %v8023_v51 }
 0x742   : > { %7482 = vmatprep.subr.mxu0 %v8023_v51  ;;  %v3788_v44 = vpop.permute.xlu1 %3787 }
 0x763   : > { %v2747_v37 = vpop.xlane.xlu0 %2746 }
 0x764   : > { %7874 = vrcp.f32 %v2747_v37 }
 0x767   : > { %v3712_v39 = vpop.permute.xlu0 %3711 }
 0x76b   : > { %v3790_v43 = vpop.permute.xlu0 %3789 }
 0x76e   : > { %v7875_v42 = vpop.eup %7874 }
 0x76f   : > { %v2763_v32 = vmul.f32 %v7875_v42, %v8538_v46  ;;  %v3868_v47 = vpop.permute.xlu0 %3867  ;;  %v3866_v46 = vpop.permute.xlu1 %3865 }
 0x771   : > { %7452 = vmatmul.mubr.msk.f32.vlgmr.msra.gmra.mrb[32].mxu0 %vm709_vm10, %v2763_v32 }
 0x772   : > { %7483 = vmatpush3.xpose.msk.msra.mxu0 %vm709_vm10, %v3634_v36  ;;  %7484 = vmatprep.mubr.msk.f32.mxu0 %vm8024_vm8, %v8023_v51 }
 0x773   : > { %7487 = vmatprep.subr.mxu0 %v8023_v51  ;;  %v3946_v48 = vpop.permute.xlu0 %3945  ;;  %v3944_v50 = vpop.permute.xlu1 %3943 }
 0x775   : > { %7485 = vmatmul.mubr.msk.f32.vlgmr.msra.gmra.mrb[34].mxu0 %vm709_vm10, %v3632_v38 }
 0x776   : > { %7488 = vmatpush3.xpose.msk.msra.mxu0 %vm709_vm10, %v3712_v39  ;;  %7489 = vmatprep.mubr.msk.f32.mxu0 %vm8024_vm8, %v8023_v51 }
 0x777   : > { %7492 = vmatprep.subr.mxu0 %v8023_v51  ;;  %v4024_v53 = vpop.permute.xlu0 %4023  ;;  %v4022_v54 = vpop.permute.xlu1 %4021 }
 0x779   : > { %7490 = vmatmul.mubr.msk.f32.vlgmr.msra.gmra.mrb[36].mxu0 %vm709_vm10, %v3710_v41 }
 0x77a   : > { %7493 = vmatpush3.xpose.msk.msra.mxu0 %vm709_vm10, %v3790_v43  ;;  %7494 = vmatprep.mubr.msk.f32.mxu0 %vm8024_vm8, %v8023_v51 }
 0x77b   : > { %7497 = vmatprep.subr.mxu0 %v8023_v51  ;;  %v4102_v55 = vpop.permute.xlu0 %4101  ;;  %v4100_v56 = vpop.permute.xlu1 %4099 }
 0x77d   : > { %7495 = vmatmul.mubr.msk.f32.vlgmr.msra.gmra.mrb[38].mxu0 %vm709_vm10, %v3788_v44 }
 0x77e   : > { %7498 = vmatpush3.xpose.msk.msra.mxu0 %vm709_vm10, %v3868_v47  ;;  %7499 = vmatprep.mubr.msk.f32.mxu0 %vm8024_vm8, %v8023_v51 }
 0x77f   : > { %7502 = vmatprep.subr.mxu0 %v8023_v51  ;;  %v4180_v57 = vpop.permute.xlu0 %4179  ;;  %v4178_v58 = vpop.permute.xlu1 %4177 }
 0x781   : > { %7500 = vmatmul.mubr.msk.f32.vlgmr.msra.gmra.mrb[40].mxu0 %vm709_vm10, %v3866_v46 }
 0x782   : > { %7503 = vmatpush3.xpose.msk.msra.mxu0 %vm709_vm10, %v3946_v48  ;;  %7504 = vmatprep.mubr.msk.f32.mxu0 %vm8024_vm8, %v8023_v51 }
 0x783   : > { %7507 = vmatprep.subr.mxu0 %v8023_v51 }
 0x785   : > { %7505 = vmatmul.mubr.msk.f32.vlgmr.msra.gmra.mrb[42].mxu0 %vm709_vm10, %v3944_v50 }
 0x786   : > { %7508 = vmatpush3.xpose.msk.msra.mxu0 %vm709_vm10, %v4024_v53  ;;  %7509 = vmatprep.mubr.msk.f32.mxu0 %vm8024_vm8, %v8023_v51 }
 0x787   : > { %7512 = vmatprep.subr.mxu0 %v8023_v51 }
 0x789   : > { %7510 = vmatmul.mubr.msk.f32.vlgmr.msra.gmra.mrb[44].mxu0 %vm709_vm10, %v4022_v54 }
 0x78a   : > { %7513 = vmatpush3.xpose.msk.msra.mxu0 %vm709_vm10, %v4102_v55  ;;  %7514 = vmatprep.mubr.msk.f32.mxu0 %vm8024_vm8, %v8023_v51 }
 0x78b   : > { %7517 = vmatprep.subr.mxu0 %v8023_v51 }
 0x78d   : > { %7515 = vmatmul.mubr.msk.f32.vlgmr.msra.gmra.mrb[46].mxu0 %vm709_vm10, %v4100_v56 }
 0x78e   : > { %7518 = vmatpush3.xpose.msk.msra.mxu0 %vm709_vm10, %v4180_v57  ;;  %7519 = vmatprep.mubr.msk.f32.mxu0 %vm8024_vm8, %v8023_v51 }
 0x78f   : > { %7527 = vmatprep.subr.mxu0 %v8023_v51 }
 0x791   : > { %7520 = vmatmul.mubr.msk.f32.vlgmr.msra.gmra.mrb[48].mxu0 %vm709_vm10, %v4178_v58 }
 0x792   : > { %7529 = vmatprep.mubr.msk.f32.mxu0 %vm8024_vm8, %v8023_v51 }
 0x7a1   : > { %v2684_v60 = vpop.xlane.xlu1 %2683 }
 0x7a2   : > { %v2702_v61 = vsub.f32 %v8556_v59, %v2684_v60 }
 0x7a4   : > { %v2712_v62 = vmul.f32 1.442695, %v2702_v61 }
 0x7a6   : > { %7876 = vpow2.f32 %v2712_v62 }
 0x7b0   : > { %v8635_v63 = vpop.eup %7876  ;;  %v2678_v0 = vpop.xlane.xlu0 %2677 }
 0x7b1   : > { %v2700_v1 = vsub.f32 %v8561_v3, %v2678_v0  ;;  %v2730_v2 = vsel %vm709_vm10, %v8635_v63, 0.0 }
 0x7b2   : > { %2731 = vadd.xlane.f32.xlu0 %v2730_v2 }
 0x7b3   : > { %v2708_v4 = vmul.f32 1.442695, %v2700_v1 }
 0x7b4   : > { %v2690_v5 = vpop.xlane.xlu0 %2689 }
 0x7b5   : > { %7878 = vpow2.f32 %v2708_v4  ;;  %v2704_v15 = vsub.f32 %v8566_v10, %v2690_v5 }
 0x7b7   : > { %v2716_v16 = vmul.f32 1.442695, %v2704_v15 }
 0x7b8   : > { %v2696_v18 = vpop.xlane.xlu0 %2695 }
 0x7b9   : > { %7880 = vpow2.f32 %v2716_v16  ;;  %v2706_v59 = vsub.f32 %v8571_v17, %v2696_v18 }
 0x7bb   : > { %v2720_v19 = vmul.f32 1.442695, %v2706_v59 }
 0x7bd   : > { %7882 = vpow2.f32 %v2720_v19 }
 0x7bf   : > { %v7879_v20 = vpop.eup %7878 }
 0x7c0   : > { %v2724_v22 = vsel %vm709_vm10, %v7879_v20, 0.0 }
 0x7c1   : > { %2725 = vadd.xlane.f32.xlu1 %v2724_v22 }
 0x7c3   : > { %v8643_v3 = vpop.eup %7880 }
 0x7c4   : > { %v2736_v25 = vsel %vm709_vm10, %v8643_v3, 0.0 }
 0x7c5   : > { %2737 = vadd.xlane.f32.xlu1 %v2736_v25 }
 0x7c7   : > { %v8647_v26 = vpop.eup %7882 }
 0x7c8   : > { %v2742_v10 = vsel %vm709_vm10, %v8647_v26, 0.0 }
 0x7c9   : > { %2743 = vadd.xlane.f32.xlu0 %v2742_v10 }
 0x7d6   : > { %2764 = vrot.lane.b32.xlu1 %v8228_v6, %s8030_s13 }
 0x7da   : > { %3068 = vrot.lane.b32.xlu1 %v8236_v11, %s8030_s13 }
 0x7de   : > { %3220 = vrot.lane.b32.xlu1 %v8240_v13, %s8030_s13 }
 0x7df   : > { %2916 = vrot.lane.b32.xlu0 %v8232_v8, %s8030_s13 }
 0x80b   : > { %v8659_v17 = vpop.f32.mrb[26].mxu0 }
 0x80c   : > { %v7423_v27 = vpop.f32.mrb[27].mxu0 }
 0x80f   : > { %v8661_v24 = vpop.f32.mrb[28].mxu0 }
 0x810   : > { %v7433_v28 = vpop.f32.mrb[29].mxu0 }
 0x813   : > { %v8663_v29 = vpop.f32.mrb[30].mxu0 }
 0x814   : > { %v7443_v33 = vpop.f32.mrb[31].mxu0 }
 0x83f   : > { %v2732_v47 = vpop.xlane.xlu0 %2731 }
 0x844   : > { %v8665_v34 = vpop.f32.mrb[32].mxu0 }
 0x845   : > { %v7453_v36 = vpop.f32.mrb[33].mxu0 }
 0x848   : > { %v3705_v37 = vpop.f32.mrb[34].mxu0 }
 0x849   : > { %v4255_v38 = vmul.f32 0.35355338, %v3705_v37  ;;  %v7486_v39 = vpop.f32.mrb[35].mxu0 }
 0x84b   : > { %v8668_v41 = vadd.f32 %v4255_v38, %v8304_v30 }
 0x84c   : > { %v3783_v42 = vpop.f32.mrb[36].mxu0 }
 0x84d   : > { %v4256_v32 = vmul.f32 0.35355338, %v3783_v42  ;;  %v7491_v43 = vpop.f32.mrb[37].mxu0  ;;  %v4271_v44 = vsel %vm709_vm10, %v8668_v41, -inf }
 0x84e   : > { %v2726_v46 = vpop.xlane.xlu1 %2725  ;;  %4272 = vmax.xlane.f32.xlu0 %v4271_v44 }
 0x84f   : > { %7884 = vrcp.f32 %v2726_v46  ;;  %v8673_v48 = vadd.f32 %v4256_v32, %v8304_v30 }
 0x850   : > { %v3861_v50 = vpop.f32.mrb[38].mxu0  ;;  %7886 = vrcp.f32 %v2732_v47 }
 0x851   : > { %v4257_v53 = vmul.f32 0.35355338, %v3861_v50  ;;  %v7496_v54 = vpop.f32.mrb[39].mxu0  ;;  %v4274_v55 = vsel %vm709_vm10, %v8673_v48, -inf }
 0x852   : > { %4275 = vmax.xlane.f32.xlu1 %v4274_v55  ;;  %v2738_v56 = vpop.xlane.xlu1 %2737 }
 0x853   : > { %v8678_v57 = vadd.f32 %v4257_v53, %v8304_v30  ;;  %7888 = vrcp.f32 %v2738_v56 }
 0x854   : > { %v3939_v58 = vpop.f32.mrb[40].mxu0 }
 0x855   : > { %v4258_v60 = vmul.f32 0.35355338, %v3939_v58  ;;  %v7501_v61 = vpop.f32.mrb[41].mxu0  ;;  %v4277_v62 = vsel %vm709_vm10, %v8678_v57, -inf }
 0x856   : > { %v2765_v0 = vpop.permute.xlu1 %2764  ;;  %4278 = vmax.xlane.f32.xlu0 %v4277_v62  ;;  %v2744_v1 = vpop.xlane.xlu0 %2743 }
 0x857   : > { %v8683_v2 = vadd.f32 %v4258_v60, %v8304_v30  ;;  %7415 = vmatpush3.msra.mxu1 %v2765_v0  ;;  %7890 = vrcp.f32 %v2744_v1  ;;  %v8738_v60 = vld [vmem:[%s9108_s4] sm:$0xff] }
 0x858   : > { %v4017_v4 = vpop.f32.mrb[42].mxu0  ;;  %7424 = vmatprep.subr.mxu1 %v8023_v51 }
 0x859   : > { %v7885_v5 = vpop.eup %7884  ;;  %v4259_v15 = vmul.f32 0.35355338, %v4017_v4  ;;  %v7506_v16 = vpop.f32.mrb[43].mxu0  ;;  %v4280_v18 = vsel %vm709_vm10, %v8683_v2, -inf }
 0x85a   : > { %v2749_v59 = vmul.f32 %v7885_v5, %v7879_v20  ;;  %4281 = vmax.xlane.f32.xlu0 %v4280_v18  ;;  %v2917_v19 = vpop.permute.xlu0 %2916  ;;  %v7887_v22 = vpop.eup %7886 }
 0x85b   : > { %v8689_v25 = vadd.f32 %v4259_v15, %v8304_v30  ;;  %v2753_v20 = vmul.f32 %v7887_v22, %v8635_v63  ;;  %v3069_v36 = vpop.permute.xlu1 %3068 }
 0x85c   : > { %7417 = vmatmul.mubr.msk.f32.vlgmr.msra.gmra.mrb[40].mxu1 %vm709_vm10, %v2749_v59  ;;  %v4095_v10 = vpop.f32.mrb[44].mxu0 }
 0x85d   : > { %7425 = vmatpush3.msra.mxu1 %v2917_v19  ;;  %v4260_v27 = vmul.f32 0.35355338, %v4095_v10  ;;  %v7511_v28 = vpop.f32.mrb[45].mxu0  ;;  %v4283_v33 = vsel %vm709_vm10, %v8689_v25, -inf  ;;  %7426 = vmatprep.mubr.msk.f32.mxu1 %vm8024_vm8, %v8023_v51  ;;  %v7889_v37 = vpop.eup %7888 }
 0x85e   : > { %4284 = vmax.xlane.f32.xlu1 %v4283_v33  ;;  %7434 = vmatprep.subr.mxu1 %v8023_v51  ;;  %v2757_v63 = vmul.f32 %v7889_v37, %v8643_v3 }
 0x85f   : > { %v8699_v38 = vadd.f32 %v4260_v27, %v8304_v30  ;;  %v3221_v46 = vpop.permute.xlu1 %3220 }
 0x860   : > { %7427 = vmatmul.mubr.msk.f32.vlgmr.msra.gmra.mrb[42].mxu1 %vm709_vm10, %v2753_v20  ;;  %v4173_v39 = vpop.f32.mrb[46].mxu0 }
 0x861   : > { %7435 = vmatpush3.msra.mxu1 %v3069_v36  ;;  %v4261_v42 = vmul.f32 0.35355338, %v4173_v39  ;;  %v7516_v32 = vpop.f32.mrb[47].mxu0  ;;  %v4286_v43 = vsel %vm709_vm10, %v8699_v38, -inf  ;;  %7436 = vmatprep.mubr.msk.f32.mxu1 %vm8024_vm8, %v8023_v51  ;;  %v7891_v44 = vpop.eup %7890 }
 0x862   : > { %4287 = vmax.xlane.f32.xlu0 %v4286_v43  ;;  %7444 = vmatprep.subr.mxu1 %v8023_v51  ;;  %v2761_v3 = vmul.f32 %v7891_v44, %v8647_v26  ;;  %v3372_v26 = vld [vmem:[%s9108_s4 + $0x8] sm:$0xff] }
 0x863   : > { %v8709_v47 = vadd.f32 %v4261_v42, %v8304_v30 }
 0x864   : > { %7437 = vmatmul.mubr.msk.f32.vlgmr.msra.gmra.mrb[44].mxu1 %vm709_vm10, %v2757_v63  ;;  %v4251_v50 = vpop.f32.mrb[48].mxu0 }
 0x865   : > { %7445 = vmatpush3.msra.mxu1 %v3221_v46  ;;  %v4262_v53 = vmul.f32 0.35355338, %v4251_v50  ;;  %v7521_v54 = vpop.f32.mrb[49].mxu0  ;;  %v4289_v55 = vsel %vm709_vm10, %v8709_v47, -inf  ;;  %7446 = vmatprep.mubr.msk.f32.mxu1 %vm8024_vm8, %v8023_v51 }
 0x866   : > { %4290 = vmax.xlane.f32.xlu1 %v4289_v55  ;;  %7454 = vmatprep.subr.mxu1 %v3372_v26 }
 0x867   : > { %v4270_v56 = vadd.f32 %v4262_v53, %v8304_v30 }
 0x868   : > { %7447 = vmatmul.mubr.msk.f32.vlgmr.msra.gmra.mrb[46].mxu1 %vm709_vm10, %v2761_v3 }
 0x869   : > { %v4292_v58 = vsel %vm709_vm10, %v4270_v56, -inf  ;;  %7455 = vmatpush3.msra.mxu1 %v3372_v26 }
 0x86a   : > { %4293 = vmax.xlane.f32.xlu0 %v4292_v58  ;;  %7468 = vmatprep.subr.mxu1 %v8738_v60 }
 0x877   : > { %4359 = vrot.lane.b32.xlu1 %v8228_v6, %s8033_s20 }
 0x87b   : > { %4511 = vrot.lane.b32.xlu1 %v8232_v8, %s8033_s20 }
 0x87f   : > { %4587 = vrot.lane.b32.xlu1 %v8234_v9, %s8033_s20 }
 0x880   : > { %4435 = vrot.lane.b32.xlu0 %v8230_v7, %s8033_s20 }
 0x883   : > { %4739 = vrot.lane.b32.xlu1 %v8238_v12, %s8033_s20 }
 0x884   : > { %4663 = vrot.lane.b32.xlu0 %v8236_v11, %s8033_s20 }
 0x8db   : > { %v4273_v61 = vpop.xlane.xlu0 %4272 }
 0x8dc   : > { %v4295_v62 = vsub.f32 %v8668_v41, %v4273_v61 }
 0x8de   : > { %v4303_v0 = vmul.f32 1.442695, %v4295_v62 }
 0x8df   : > { %v4276_v1 = vpop.xlane.xlu1 %4275 }
 0x8e0   : > { %7892 = vpow2.f32 %v4303_v0  ;;  %v4296_v4 = vsub.f32 %v8673_v48, %v4276_v1 }
 0x8e2   : > { %v4305_v5 = vmul.f32 1.442695, %v4296_v4 }
 0x8e3   : > { %v4279_v15 = vpop.xlane.xlu0 %4278 }
 0x8e4   : > { %7894 = vpow2.f32 %v4305_v5  ;;  %v4297_v16 = vsub.f32 %v8678_v57, %v4279_v15 }
 0x8e6   : > { %v4307_v18 = vmul.f32 1.442695, %v4297_v16 }
 0x8e7   : > { %v4282_v59 = vpop.xlane.xlu0 %4281 }
 0x8e8   : > { %7896 = vpow2.f32 %v4307_v18  ;;  %v4298_v19 = vsub.f32 %v8683_v2, %v4282_v59 }
 0x8ea   : > { %v8745_v22 = vpop.eup %7892  ;;  %v4309_v10 = vmul.f32 1.442695, %v4298_v19 }
 0x8eb   : > { %v4285_v27 = vpop.xlane.xlu1 %4284  ;;  %v4319_v41 = vsel %vm709_vm10, %v8745_v22, 0.0 }
 0x8ec   : > { %7898 = vpow2.f32 %v4309_v10  ;;  %v4299_v48 = vsub.f32 %v8689_v25, %v4285_v27  ;;  %4320 = vadd.xlane.f32.xlu1 %v4319_v41 }
 0x8ee   : > { %v8750_v28 = vpop.eup %7894  ;;  %v4311_v33 = vmul.f32 1.442695, %v4299_v48 }
 0x8ef   : > { %v4288_v57 = vpop.xlane.xlu0 %4287  ;;  %v4322_v20 = vsel %vm709_vm10, %v8750_v28, 0.0 }
 0x8f0   : > { %7900 = vpow2.f32 %v4311_v33  ;;  %v4300_v2 = vsub.f32 %v8699_v38, %v4288_v57  ;;  %4323 = vadd.xlane.f32.xlu0 %v4322_v20 }
 0x8f2   : > { %v8755_v36 = vpop.eup %7896  ;;  %v4313_v37 = vmul.f32 1.442695, %v4300_v2  ;;  %v4967_v2 = vld [vmem:[%s9108_s4 + $0x10] sm:$0xff] }
 0x8f3   : > { %v4291_v39 = vpop.xlane.xlu1 %4290  ;;  %v4325_v42 = vsel %vm709_vm10, %v8755_v36, 0.0 }
 0x8f4   : > { %7902 = vpow2.f32 %v4313_v37  ;;  %v4301_v25 = vsub.f32 %v8709_v47, %v4291_v39  ;;  %4326 = vadd.xlane.f32.xlu1 %v4325_v42 }
 0x8f6   : > { %v8760_v32 = vpop.eup %7898  ;;  %v4315_v43 = vmul.f32 1.442695, %v4301_v25 }
 0x8f7   : > { %v4294_v63 = vpop.xlane.xlu0 %4293  ;;  %v4328_v44 = vsel %vm709_vm10, %v8760_v32, 0.0 }
 0x8f8   : > { %7904 = vpow2.f32 %v4315_v43  ;;  %v4302_v38 = vsub.f32 %v4270_v56, %v4294_v63  ;;  %4329 = vadd.xlane.f32.xlu0 %v4328_v44 }
 0x8fa   : > { %v8764_v46 = vpop.eup %7900  ;;  %v4317_v50 = vmul.f32 1.442695, %v4302_v38 }
 0x8fb   : > { %v4436_v53 = vpop.permute.xlu0 %4435  ;;  %v4331_v54 = vsel %vm709_vm10, %v8764_v46, 0.0 }
 0x8fc   : > { %7906 = vpow2.f32 %v4317_v50  ;;  %4332 = vadd.xlane.f32.xlu1 %v4331_v54  ;;  %7528 = vmatpush3.msra.mxu0 %v4436_v53 }
 0x8fd   : > { %7537 = vmatprep.subr.mxu0 %v8023_v51 }
 0x8fe   : > { %v8769_v47 = vpop.eup %7902 }
 0x8ff   : > { %v4334_v55 = vsel %vm709_vm10, %v8769_v47, 0.0 }
 0x900   : > { %4335 = vadd.xlane.f32.xlu0 %v4334_v55 }
 0x902   : > { %v8773_v3 = vpop.eup %7904 }
 0x903   : > { %v4337_v56 = vsel %vm709_vm10, %v8773_v3, 0.0 }
 0x904   : > { %4338 = vadd.xlane.f32.xlu1 %v4337_v56 }
 0x906   : > { %v8777_v58 = vpop.eup %7906 }
 0x907   : > { %v4340_v26 = vsel %vm709_vm10, %v8777_v58, 0.0 }
 0x908   : > { %4341 = vadd.xlane.f32.xlu0 %v4340_v26 }
 0x915   : > { %4891 = vrot.lane.b32.xlu1 %v8242_v14, %s8033_s20 }
 0x919   : > { %5105 = vrot.lane.b32.xlu1 %v8228_v6, %s8034_s17 }
 0x91d   : > { %5183 = vrot.lane.b32.xlu1 %v8230_v7, %s8034_s17 }
 0x91e   : > { %4815 = vrot.lane.b32.xlu0 %v8240_v13, %s8033_s20 }
 0x921   : > { %5261 = vrot.lane.b32.xlu1 %v8232_v8, %s8034_s17 }
 0x922   : > { %5107 = vrot.lane.b32.xlu0 %v8228_v6, %s8035_s26 }
 0x925   : > { %5339 = vrot.lane.b32.xlu1 %v8234_v9, %s8034_s17 }
 0x926   : > { %5185 = vrot.lane.b32.xlu0 %v8230_v7, %s8035_s26 }
 0x929   : > { %5497 = vrot.lane.b32.xlu1 %v8238_v12, %s8035_s26 }
 0x92a   : > { %5263 = vrot.lane.b32.xlu0 %v8232_v8, %s8035_s26 }
 0x92d   : > { %5495 = vrot.lane.b32.xlu1 %v8238_v12, %s8034_s17 }
 0x92e   : > { %5341 = vrot.lane.b32.xlu0 %v8234_v9, %s8035_s26 }
 0x92f   : > { %v2836_v61 = vpop.f32.mrb[40].mxu1 }
 0x930   : > { %v7418_v62 = vpop.f32.mrb[41].mxu1  ;;  %7456 = vmatprep.mubr.msk.f32.mxu1 %vm709_vm10, %v2836_v61 }
 0x931   : > { %5653 = vrot.lane.b32.xlu1 %v8242_v14, %s8035_s26  ;;  %7457 = vmatmul.mubr.msk.f32.vlgmr.msra.gmra.mrb[48].mxu1 %vm709_vm10, %v8659_v17 }
 0x932   : > { %5419 = vrot.lane.b32.xlu0 %v8236_v11, %s8035_s26  ;;  %7469 = vmatpush3.msra.mxu1 %v8738_v60 }
 0x933   : > { %v2988_v0 = vpop.f32.mrb[42].mxu1  ;;  %7522 = vmatprep.subr.mxu1 %v8023_v51 }
 0x934   : > { %v7428_v1 = vpop.f32.mrb[43].mxu1  ;;  %7459 = vmatprep.mubr.msk.f32.mxu1 %vm709_vm10, %v2988_v0 }
 0x935   : > { %5651 = vrot.lane.b32.xlu1 %v8242_v14, %s8034_s17  ;;  %7460 = vmatmul.mubr.msk.f32.gmra.mrb[50].mxu1 %vm709_vm10, %v8661_v24  ;;  %v4360_v24 = vpop.permute.xlu1 %4359 }
 0x936   : > { %5417 = vrot.lane.b32.xlu0 %v8236_v11, %s8034_s17 }
 0x937   : > { %v3140_v17 = vpop.f32.mrb[44].mxu1 }
 0x938   : > { %v7438_v4 = vpop.f32.mrb[45].mxu1  ;;  %7462 = vmatprep.mubr.msk.f32.mxu1 %vm709_vm10, %v3140_v17 }
 0x939   : > { %7463 = vmatmul.mubr.msk.f32.gmra.mrb[52].mxu1 %vm709_vm10, %v8663_v29  ;;  %v4664_v29 = vpop.permute.xlu0 %4663 }
 0x93a   : > { %5575 = vrot.lane.b32.xlu0 %v8240_v13, %s8035_s26 }
 0x93b   : > { %v3292_v60 = vpop.f32.mrb[46].mxu1 }
 0x93c   : > { %v7448_v5 = vpop.f32.mrb[47].mxu1  ;;  %7465 = vmatprep.mubr.msk.f32.mxu1 %vm709_vm10, %v3292_v60 }
 0x93d   : > { %7466 = vmatmul.mubr.msk.f32.gmra.mrb[54].mxu1 %vm709_vm10, %v8665_v34 }
 0x93e   : > { %5573 = vrot.lane.b32.xlu0 %v8240_v13, %s8034_s17  ;;  %7470 = vmatprep.mubr.msk.f32.mxu1 %vm709_vm10, %v8524_v40  ;;  %s9057_s17 = scalar_lea.hbm %s9112_s8, %s7001_s22 }
 0x941   : > { %7471 = vmatmul.mubr.msk.f32.vlgmr.msra.gmra.mrb[48].mxu1 %vm709_vm10, %v8442_v21  ;;  %v4512_v21 = vpop.permute.xlu1 %4511 }
 0x942   : > { %7523 = vmatpush3.msra.mxu1 %v4360_v24  ;;  %7473 = vmatprep.mubr.msk.f32.mxu1 %vm709_vm10, %v8536_v45 }
 0x943   : > { %7532 = vmatprep.subr.mxu1 %v8023_v51 }
 0x945   : > { %7474 = vmatmul.mubr.msk.f32.gmra.mrb[50].mxu1 %vm709_vm10, %v8446_v23  ;;  %v4588_v40 = vpop.permute.xlu1 %4587 }
 0x946   : > { %7476 = vmatprep.mubr.msk.f32.mxu1 %vm709_vm10, %v8543_v49 }
 0x949   : > { %7477 = vmatmul.mubr.msk.f32.gmra.mrb[52].mxu1 %vm709_vm10, %v8452_v31  ;;  %v4740_v45 = vpop.permute.xlu1 %4739 }
 0x94a   : > { %7479 = vmatprep.mubr.msk.f32.mxu1 %vm709_vm10, %v8553_v52 }
 0x94d   : > { %7480 = vmatmul.mubr.msk.f32.gmra.mrb[54].mxu1 %vm709_vm10, %v8454_v35 }
 0x94e   : > { %7524 = vmatprep.mubr.msk.f32.mxu1 %vm8024_vm8, %v8023_v51 }
 0x979   : > { %v4321_v23 = vpop.xlane.xlu1 %4320 }
 0x97a   : > { %7908 = vrcp.f32 %v4321_v23 }
 0x97d   : > { %v4324_v34 = vpop.xlane.xlu0 %4323 }
 0x97e   : > { %7910 = vrcp.f32 %v4324_v34 }
 0x981   : > { %v4327_v49 = vpop.xlane.xlu1 %4326 }
 0x982   : > { %7912 = vrcp.f32 %v4327_v49 }
 0x984   : > { %v7909_v31 = vpop.eup %7908 }
 0x985   : > { %v4344_v15 = vmul.f32 %v7909_v31, %v8745_v22  ;;  %v4330_v52 = vpop.xlane.xlu0 %4329 }
 0x986   : > { %7914 = vrcp.f32 %v4330_v52 }
 0x987   : > { %7525 = vmatmul.mubr.msk.f32.vlgmr.msra.gmra.mrb[56].mxu1 %vm709_vm10, %v4344_v15 }
 0x988   : > { %v7911_v35 = vpop.eup %7910  ;;  %7533 = vmatpush3.msra.mxu1 %v4512_v21  ;;  %7534 = vmatprep.mubr.msk.f32.mxu1 %vm8024_vm8, %v8023_v51 }
 0x989   : > { %v4346_v16 = vmul.f32 %v7911_v35, %v8750_v28  ;;  %v4333_v18 = vpop.xlane.xlu1 %4332  ;;  %7542 = vmatprep.subr.mxu1 %v8023_v51 }
 0x98a   : > { %7916 = vrcp.f32 %v4333_v18 }
 0x98b   : > { %7530 = vmatmul.mubr.msk.f32.vlgmr.msra.gmra.mrb[50].mxu0 %vm709_vm10, %v4346_v16 }
 0x98c   : > { %v7913_v59 = vpop.eup %7912  ;;  %7538 = vmatpush3.msra.mxu0 %v4588_v40  ;;  %7539 = vmatprep.mubr.msk.f32.mxu0 %vm8024_vm8, %v8023_v51 }
 0x98d   : > { %v4348_v19 = vmul.f32 %v7913_v59, %v8755_v36  ;;  %v4336_v22 = vpop.xlane.xlu0 %4335  ;;  %7547 = vmatprep.subr.mxu0 %v8023_v51 }
 0x98e   : > { %7918 = vrcp.f32 %v4336_v22 }
 0x98f   : > { %7535 = vmatmul.mubr.msk.f32.vlgmr.msra.gmra.mrb[58].mxu1 %vm709_vm10, %v4348_v19 }
 0x990   : > { %v7915_v10 = vpop.eup %7914  ;;  %7543 = vmatpush3.msra.mxu1 %v4664_v29  ;;  %7544 = vmatprep.mubr.msk.f32.mxu1 %vm8024_vm8, %v8023_v51 }
 0x991   : > { %v4350_v27 = vmul.f32 %v7915_v10, %v8760_v32  ;;  %v4339_v41 = vpop.xlane.xlu1 %4338  ;;  %7552 = vmatprep.subr.mxu1 %v8023_v51 }
 0x992   : > { %7920 = vrcp.f32 %v4339_v41 }
 0x993   : > { %7540 = vmatmul.mubr.msk.f32.vlgmr.msra.gmra.mrb[52].mxu0 %vm709_vm10, %v4350_v27 }
 0x994   : > { %v7917_v48 = vpop.eup %7916  ;;  %7548 = vmatpush3.msra.mxu0 %v4740_v45  ;;  %7549 = vmatprep.mubr.msk.f32.mxu0 %vm8024_vm8, %v8023_v51 }
 0x995   : > { %v4352_v28 = vmul.f32 %v7917_v48, %v8764_v46  ;;  %v4892_v33 = vpop.permute.xlu1 %4891  ;;  %v4342_v57 = vpop.xlane.xlu0 %4341  ;;  %7557 = vmatprep.subr.mxu0 %v8023_v51 }
 0x996   : > { %7922 = vrcp.f32 %v4342_v57 }
 0x997   : > { %7545 = vmatmul.mubr.msk.f32.vlgmr.msra.gmra.mrb[60].mxu1 %vm709_vm10, %v4352_v28 }
 0x998   : > { %v7919_v20 = vpop.eup %7918  ;;  %7554 = vmatprep.mubr.msk.f32.mxu1 %vm8024_vm8, %v8023_v51 }
 0x999   : > { %v4354_v36 = vmul.f32 %v7919_v20, %v8769_v47  ;;  %v5106_v37 = vpop.permute.xlu1 %5105  ;;  %v4816_v39 = vpop.permute.xlu0 %4815 }
 0x99a   : > { %7553 = vmatpush3.msra.mxu1 %v4816_v39 }
 0x99b   : > { %7550 = vmatmul.mubr.msk.f32.vlgmr.msra.gmra.mrb[54].mxu0 %vm709_vm10, %v4354_v36  ;;  %7562 = vmatprep.subr.mxu1 %v4967_v2 }
 0x99c   : > { %v7921_v42 = vpop.eup %7920  ;;  %7558 = vmatpush3.msra.mxu0 %v4892_v33  ;;  %7559 = vmatprep.mubr.msk.f32.mxu0 %vm8024_vm8, %v8023_v51 }
 0x99d   : > { %v4356_v25 = vmul.f32 %v7921_v42, %v8773_v3  ;;  %v5184_v32 = vpop.permute.xlu1 %5183  ;;  %v5108_v43 = vpop.permute.xlu0 %5107  ;;  %7576 = vmatprep.subr.mxu0 %v8023_v51 }
 0x99f   : > { %7555 = vmatmul.mubr.msk.f32.vlgmr.msra.gmra.mrb[62].mxu1 %vm709_vm10, %v4356_v25 }
 0x9a0   : > { %v7923_v63 = vpop.eup %7922  ;;  %7563 = vmatpush3.msra.mxu1 %v4967_v2 }
 0x9a1   : > { %v4358_v44 = vmul.f32 %v7923_v63, %v8777_v58  ;;  %v5262_v38 = vpop.permute.xlu1 %5261  ;;  %7596 = vmatprep.subr.mxu1 %v8023_v51  ;;  %v5186_v46 = vpop.permute.xlu0 %5185 }
 0x9a3   : > { %7560 = vmatmul.mubr.msk.f32.vlgmr.msra.gmra.mrb[56].mxu0 %vm709_vm10, %v4358_v44 }
 0x9a4   : > { %7577 = vmatpush3.xpose.msk.msra.mxu0 %vm709_vm10, %v5108_v43  ;;  %7578 = vmatprep.mubr.msk.f32.mxu0 %vm8024_vm8, %v8023_v51 }
 0x9a5   : > { %v5340_v50 = vpop.permute.xlu1 %5339  ;;  %7581 = vmatprep.subr.mxu0 %v8023_v51  ;;  %v5264_v53 = vpop.permute.xlu0 %5263 }
 0x9a7   : > { %7579 = vmatmul.mubr.msk.f32.vlgmr.msra.gmra.mrb[58].mxu0 %vm709_vm10, %v5106_v37 }
 0x9a8   : > { %7582 = vmatpush3.xpose.msk.msra.mxu0 %vm709_vm10, %v5186_v46  ;;  %7583 = vmatprep.mubr.msk.f32.mxu0 %vm8024_vm8, %v8023_v51 }
 0x9a9   : > { %v5498_v54 = vpop.permute.xlu1 %5497  ;;  %7586 = vmatprep.subr.mxu0 %v8023_v51  ;;  %v5342_v55 = vpop.permute.xlu0 %5341 }
 0x9ab   : > { %7584 = vmatmul.mubr.msk.f32.vlgmr.msra.gmra.mrb[60].mxu0 %vm709_vm10, %v5184_v32 }
 0x9ac   : > { %7587 = vmatpush3.xpose.msk.msra.mxu0 %vm709_vm10, %v5264_v53  ;;  %7588 = vmatprep.mubr.msk.f32.mxu0 %vm8024_vm8, %v8023_v51 }
 0x9ad   : > { %7591 = vmatprep.subr.mxu0 %v8023_v51  ;;  %v5496_v47 = vpop.permute.xlu1 %5495  ;;  %v5420_v62 = vpop.permute.xlu0 %5419 }
 0x9af   : > { %7589 = vmatmul.mubr.msk.f32.vlgmr.msra.gmra.mrb[62].mxu0 %vm709_vm10, %v5262_v38 }
 0x9b0   : > { %7592 = vmatpush3.xpose.msk.msra.mxu0 %vm709_vm10, %v5342_v55  ;;  %7593 = vmatprep.mubr.msk.f32.mxu0 %vm8024_vm8, %v8023_v51 }
 0x9b1   : > { %7601 = vmatprep.subr.mxu0 %v8023_v51  ;;  %v5654_v3 = vpop.permute.xlu1 %5653  ;;  %v5418_v45 = vpop.permute.xlu0 %5417 }
 0x9b3   : > { %7594 = vmatmul.mubr.msk.f32.vlgmr.msra.gmra.mrb[64].mxu0 %vm709_vm10, %v5340_v50 }
 0x9b4   : > { %7602 = vmatpush3.xpose.msk.msra.mxu0 %vm709_vm10, %v5498_v54  ;;  %7603 = vmatprep.mubr.msk.f32.mxu0 %vm8024_vm8, %v8023_v51 }
 0x9b5   : > { %7611 = vmatprep.subr.mxu0 %v8023_v51  ;;  %v5652_v56 = vpop.permute.xlu1 %5651  ;;  %v5576_v31 = vpop.permute.xlu0 %5575 }
 0x9b7   : > { %7604 = vmatmul.mubr.msk.f32.vlgmr.msra.gmra.mrb[66].mxu0 %vm709_vm10, %v5496_v47 }
 0x9b8   : > { %7612 = vmatpush3.xpose.msk.msra.mxu0 %vm709_vm10, %v5654_v3  ;;  %7613 = vmatprep.mubr.msk.f32.mxu0 %vm8024_vm8, %v8023_v51 }
 0x9b9   : > { %7621 = vmatprep.subr.mxu0 %v8023_v51  ;;  %v5574_v18 = vpop.permute.xlu0 %5573 }
 0x9bb   : > { %7614 = vmatmul.mubr.msk.f32.vlgmr.msra.gmra.mrb[68].mxu0 %vm709_vm10, %v5652_v56 }
 0x9bc   : > { %7623 = vmatprep.mubr.msk.f32.mxu0 %vm8024_vm8, %v8023_v51 }
 0xa5a   : > { %v4431_v58 = vpop.f32.mrb[56].mxu1 }
 0xa5b   : > { %v7526_v26 = vpop.f32.mrb[57].mxu1  ;;  %7564 = vmatprep.mubr.msk.f32.mxu1 %vm709_vm10, %v4431_v58 }
 0xa5e   : > { %v4507_v61 = vpop.f32.mrb[50].mxu0 }
 0xa5f   : > { %v7531_v0 = vpop.f32.mrb[51].mxu0  ;;  %7565 = vmatmul.mubr.msk.f32.vlgmr.msra.gmra.mrb[48].mxu1 %vm709_vm10, %v4507_v61 }
 0xa60   : > { %7597 = vmatpush3.xpose.msk.msra.mxu1 %vm709_vm10, %v5420_v62 }
 0xa61   : > { %7606 = vmatprep.subr.mxu1 %v8023_v51 }
 0xa62   : > { %v4583_v1 = vpop.f32.mrb[58].mxu1 }
 0xa63   : > { %v7536_v17 = vpop.f32.mrb[59].mxu1  ;;  %7567 = vmatprep.mubr.msk.f32.mxu1 %vm709_vm10, %v4583_v1 }
 0xa66   : > { %v4659_v4 = vpop.f32.mrb[52].mxu0 }
 0xa67   : > { %v7541_v60 = vpop.f32.mrb[53].mxu0  ;;  %7568 = vmatmul.mubr.msk.f32.gmra.mrb[50].mxu1 %vm709_vm10, %v4659_v4 }
 0xa6a   : > { %v4735_v5 = vpop.f32.mrb[60].mxu1 }
 0xa6b   : > { %v7546_v24 = vpop.f32.mrb[61].mxu1  ;;  %7570 = vmatprep.mubr.msk.f32.mxu1 %vm709_vm10, %v4735_v5 }
 0xa6e   : > { %v4811_v21 = vpop.f32.mrb[54].mxu0 }
 0xa6f   : > { %v7551_v40 = vpop.f32.mrb[55].mxu0  ;;  %7571 = vmatmul.mubr.msk.f32.gmra.mrb[52].mxu1 %vm709_vm10, %v4811_v21 }
 0xa72   : > { %v4887_v29 = vpop.f32.mrb[62].mxu1 }
 0xa73   : > { %v7556_v23 = vpop.f32.mrb[63].mxu1  ;;  %7573 = vmatprep.mubr.msk.f32.mxu1 %vm709_vm10, %v4887_v29 }
 0xa76   : > { %v4963_v34 = vpop.f32.mrb[56].mxu0 }
 0xa77   : > { %v7561_v49 = vpop.f32.mrb[57].mxu0  ;;  %7574 = vmatmul.mubr.msk.f32.gmra.mrb[54].mxu1 %vm709_vm10, %v4963_v34 }
 0xa78   : > { %7598 = vmatprep.mubr.msk.f32.mxu1 %vm8024_vm8, %v8023_v51 }
 0xa7a   : > { %v5179_v15 = vpop.f32.mrb[58].mxu0 }
 0xa7b   : > { %v5729_v52 = vmul.f32 0.35355338, %v5179_v15  ;;  %v7580_v35 = vpop.f32.mrb[59].mxu0  ;;  %7599 = vmatmul.mubr.msk.f32.vlgmr.msra.gmra.mrb[64].mxu1 %vm709_vm10, %v5418_v45 }
 0xa7c   : > { %7607 = vmatpush3.xpose.msk.msra.mxu1 %vm709_vm10, %v5576_v31  ;;  %7608 = vmatprep.mubr.msk.f32.mxu1 %vm8024_vm8, %v8023_v51 }
 0xa7d   : > { %v8928_v16 = vadd.f32 %v5729_v52, %v8304_v30  ;;  %7616 = vmatprep.subr.mxu1 %v8023_v51 }
 0xa7e   : > { %v5257_v59 = vpop.f32.mrb[60].mxu0 }
 0xa7f   : > { %v5730_v19 = vmul.f32 0.35355338, %v5257_v59  ;;  %v7585_v22 = vpop.f32.mrb[61].mxu0  ;;  %7609 = vmatmul.mubr.msk.f32.vlgmr.msra.gmra.mrb[66].mxu1 %vm709_vm10, %v5574_v18  ;;  %v5745_v10 = vsel %vm709_vm10, %v8928_v16, -inf }
 0xa80   : > { %5746 = vmax.xlane.f32.xlu0 %v5745_v10  ;;  %7618 = vmatprep.mubr.msk.f32.mxu1 %vm8024_vm8, %v8023_v51 }
 0xa81   : > { %v5738_v27 = vadd.f32 %v5730_v19, %v8304_v30 }
 0xa82   : > { %v5335_v41 = vpop.f32.mrb[62].mxu0 }
 0xa83   : > { %v5731_v48 = vmul.f32 0.35355338, %v5335_v41  ;;  %v7590_v28 = vpop.f32.mrb[63].mxu0  ;;  %v5748_v33 = vsel %vm709_vm10, %v5738_v27, -inf }
 0xa84   : > { %5749 = vmax.xlane.f32.xlu1 %v5748_v33 }
 0xa85   : > { %v5739_v57 = vadd.f32 %v5731_v48, %v8304_v30 }
 0xa86   : > { %v5413_v20 = vpop.f32.mrb[64].mxu0 }
 0xa87   : > { %v5732_v2 = vmul.f32 0.35355338, %v5413_v20  ;;  %v7595_v36 = vpop.f32.mrb[65].mxu0  ;;  %v5751_v37 = vsel %vm709_vm10, %v5739_v57, -inf }
 0xa88   : > { %5752 = vmax.xlane.f32.xlu0 %v5751_v37 }
 0xa89   : > { %v5740_v39 = vadd.f32 %v5732_v2, %v8304_v30 }
 0xa8a   : > { %v5569_v42 = vpop.f32.mrb[66].mxu0 }
 0xa8b   : > { %v5734_v25 = vmul.f32 0.35355338, %v5569_v42  ;;  %v7605_v32 = vpop.f32.mrb[67].mxu0  ;;  %v5754_v43 = vsel %vm709_vm10, %v5740_v39, -inf }
 0xa8c   : > { %5755 = vmax.xlane.f32.xlu0 %v5754_v43 }
 0xa8d   : > { %v5742_v63 = vadd.f32 %v5734_v25, %v8304_v30 }
 0xa8e   : > { %v5725_v44 = vpop.f32.mrb[68].mxu0 }
 0xa8f   : > { %v5736_v38 = vmul.f32 0.35355338, %v5725_v44  ;;  %v7615_v46 = vpop.f32.mrb[69].mxu0  ;;  %v5760_v50 = vsel %vm709_vm10, %v5742_v63, -inf }
 0xa90   : > { %5761 = vmax.xlane.f32.xlu0 %v5760_v50 }
 0xa91   : > { %v5744_v53 = vadd.f32 %v5736_v38, %v8304_v30 }
 0xa93   : > { %v5766_v54 = vsel %vm709_vm10, %v5744_v53, -inf }
 0xa94   : > { %5767 = vmax.xlane.f32.xlu0 %v5766_v54 }
 0xb0d   : > { %v5747_v47 = vpop.xlane.xlu0 %5746 }
 0xb0e   : > { %v5769_v31 = vsub.f32 %v8928_v16, %v5747_v47 }
 0xb10   : > { %v5777_v15 = vmul.f32 1.442695, %v5769_v31 }
 0xb11   : > { %v5750_v55 = vpop.xlane.xlu1 %5749 }
 0xb12   : > { %v5770_v3 = vsub.f32 %v5738_v27, %v5750_v55 }
 0xb14   : > { %v5779_v56 = vmul.f32 1.442695, %v5770_v3 }
 0xb15   : > { %v5753_v58 = vpop.xlane.xlu0 %5752 }
 0xb16   : > { %7924 = vpow2.f32 %v5779_v56  ;;  %v5771_v52 = vsub.f32 %v5739_v57, %v5753_v58 }
 0xb18   : > { %v5781_v35 = vmul.f32 1.442695, %v5771_v52 }
 0xb19   : > { %v5756_v26 = vpop.xlane.xlu0 %5755 }
 0xb1a   : > { %v5772_v61 = vsub.f32 %v5740_v39, %v5756_v26 }
 0xb1c   : > { %v5783_v62 = vmul.f32 1.442695, %v5772_v61 }
 0xb1d   : > { %v5762_v0 = vpop.xlane.xlu0 %5761 }
 0xb1e   : > { %7926 = vpow2.f32 %v5783_v62  ;;  %v5774_v1 = vsub.f32 %v5742_v63, %v5762_v0 }
 0xb20   : > { %v7925_v17 = vpop.eup %7924  ;;  %v5787_v4 = vmul.f32 1.442695, %v5774_v1 }
 0xb21   : > { %v5768_v60 = vpop.xlane.xlu0 %5767  ;;  %v5796_v5 = vsel %vm709_vm10, %v7925_v17, 0.0 }
 0xb22   : > { %7928 = vpow2.f32 %v5787_v4  ;;  %v5776_v24 = vsub.f32 %v5744_v53, %v5768_v60  ;;  %5797 = vadd.xlane.f32.xlu0 %v5796_v5 }
 0xb24   : > { %v5791_v21 = vmul.f32 1.442695, %v5776_v24 }
 0xb26   : > { %7930 = vpow2.f32 %v5791_v21 }
 0xb27   : > { %7932 = vpow2.f32 %v5777_v15 }
 0xb28   : > { %v8947_v40 = vpop.eup %7926  ;;  %7934 = vpow2.f32 %v5781_v35 }
 0xb29   : > { %v5802_v45 = vsel %vm709_vm10, %v8947_v40, 0.0 }
 0xb2a   : > { %5803 = vadd.xlane.f32.xlu0 %v5802_v45  ;;  %v6441_v45 = vld [vmem:[%s9108_s4 + $0x18] sm:$0xff] }
 0xb2c   : > { %v8951_v29 = vpop.eup %7928 }
 0xb2d   : > { %v5808_v23 = vsel %vm709_vm10, %v8951_v29, 0.0 }
 0xb2e   : > { %5809 = vadd.xlane.f32.xlu0 %v5808_v23 }
 0xb30   : > { %v8955_v34 = vpop.eup %7930 }
 0xb31   : > { %v5814_v49 = vsel %vm709_vm10, %v8955_v34, 0.0  ;;  %v7933_v48 = vpop.eup %7932 }
 0xb32   : > { %5815 = vadd.xlane.f32.xlu0 %v5814_v49  ;;  %v5793_v28 = vsel %vm709_vm10, %v7933_v48, 0.0  ;;  %v7935_v33 = vpop.eup %7934 }
 0xb48   : > { %5909 = vrot.lane.b32.xlu0 %v8230_v7, %s8036_s12 }
 0xb4c   : > { %6137 = vrot.lane.b32.xlu0 %v8236_v11, %s8036_s12 }
 0xb4e   : > { %v5491_v18 = vpop.f32.mrb[64].mxu1 }
 0xb4f   : > { %v5733_v59 = vmul.f32 0.35355338, %v5491_v18  ;;  %v7600_v19 = vpop.f32.mrb[65].mxu1 }
 0xb50   : > { %6289 = vrot.lane.b32.xlu0 %v8240_v13, %s8036_s12  ;;  %v5799_v13 = vsel %vm709_vm10, %v7935_v33, 0.0 }
 0xb51   : > { %v5741_v22 = vadd.f32 %v5733_v59, %v8304_v30 }
 0xb52   : > { %v5647_v16 = vpop.f32.mrb[66].mxu1 }
 0xb53   : > { %v5735_v10 = vmul.f32 0.35355338, %v5647_v16  ;;  %v7610_v27 = vpop.f32.mrb[67].mxu1  ;;  %v5757_v7 = vsel %vm709_vm10, %v5741_v22, -inf  ;;  %v6603_v16 = vld [vmem:[%s9110_s6 + $0x8] sm:$0xff] }
 0xb54   : > { %5758 = vmax.xlane.f32.xlu1 %v5757_v7  ;;  %v6604_v27 = vld [vmem:[%s9110_s6 + $0x10] sm:$0xff]  ;;  %v6605_v7 = vld [vmem:[%s9110_s6 + $0x18] sm:$0xff] }
 0xb55   : > { %v5743_v41 = vadd.f32 %v5735_v10, %v8304_v30 }
 0xb57   : > { %v5763_v11 = vsel %vm709_vm10, %v5743_v41, -inf }
 0xb58   : > { %5764 = vmax.xlane.f32.xlu1 %v5763_v11 }
 0xb5c   : > { %5794 = vadd.xlane.f32.xlu1 %v5793_v28 }
 0xb60   : > { %5800 = vadd.xlane.f32.xlu1 %v5799_v13 }
 0xb71   : > { %5833 = vrot.lane.b32.xlu1 %v8228_v6, %s8036_s12 }
 0xb75   : > { %5985 = vrot.lane.b32.xlu1 %v8232_v8, %s8036_s12 }
 0xb79   : > { %6061 = vrot.lane.b32.xlu1 %v8234_v9, %s8036_s12 }
 0xb7d   : > { %6213 = vrot.lane.b32.xlu1 %v8238_v12, %s8036_s12 }
 0xbaf   : > { %v5798_v30 = vpop.xlane.xlu0 %5797 }
 0xbb0   : > { %7936 = vrcp.f32 %v5798_v30 }
 0xbb7   : > { %v5804_v57 = vpop.xlane.xlu0 %5803 }
 0xbba   : > { %v7937_v36 = vpop.eup %7936 }
 0xbbb   : > { %v5810_v20 = vpop.xlane.xlu0 %5809  ;;  %v5820_v37 = vmul.f32 %v7937_v36, %v7925_v17 }
 0xbbf   : > { %v5816_v2 = vpop.xlane.xlu0 %5815 }
 0xbc3   : > { %v5910_v39 = vpop.permute.xlu0 %5909 }
 0xbc4   : > { %7622 = vmatpush3.msra.mxu0 %v5910_v39 }
 0xbc5   : > { %7624 = vmatmul.mubr.msk.f32.vlgmr.msra.gmra.mrb[70].mxu0 %vm709_vm10, %v5820_v37  ;;  %7631 = vmatprep.subr.mxu0 %v8023_v51 }
 0xbc6   : > { %7633 = vmatprep.mubr.msk.f32.mxu0 %vm8024_vm8, %v8023_v51 }
 0xbc7   : > { %v6138_v62 = vpop.permute.xlu0 %6137 }
 0xbe1   : > { %v5759_v6 = vpop.xlane.xlu1 %5758 }
 0xbe2   : > { %v5773_v8 = vsub.f32 %v5741_v22, %v5759_v6  ;;  %v6602_v22 = vld [vmem:[%s9110_s6] sm:$0xff] }
 0xbe3   : > { %v7736_v10 = vpack.c.bf16 %v6603_v16, %v6602_v22 }
 0xbe4   : > { %v5785_v9 = vmul.f32 1.442695, %v5773_v8 }
 0xbe5   : > { %v5765_v12 = vpop.xlane.xlu1 %5764 }
 0xbe6   : > { %7938 = vpow2.f32 %v5785_v9  ;;  %v5775_v42 = vsub.f32 %v5743_v41, %v5765_v12  ;;  %v7740_v41 = vpack.c.bf16 %v6605_v7, %v6604_v27 }
 0xbe8   : > { %v5789_v25 = vmul.f32 1.442695, %v5775_v42 }
 0xbe9   : > { %v5795_v32 = vpop.xlane.xlu1 %5794 }
 0xbea   : > { %7940 = vpow2.f32 %v5789_v25 }
 0xbeb   : > { %7942 = vrcp.f32 %v5795_v32 }
 0xbec   : > { %7944 = vrcp.f32 %v5804_v57  ;;  %v6986_v57 = vld [vmem:[%s9109_s5] ss:$0 sm:$0xff] }
 0xbed   : > { %v5801_v43 = vpop.xlane.xlu1 %5800 }
 0xbee   : > { %7946 = vrcp.f32 %v5801_v43 }
 0xbef   : > { %7948 = vrcp.f32 %v5810_v20 }
 0xbf0   : > { %v7939_v63 = vpop.eup %7938  ;;  %7950 = vrcp.f32 %v5816_v2 }
 0xbf1   : > { %v5834_v44 = vpop.permute.xlu1 %5833  ;;  %v5805_v38 = vsel %vm709_vm10, %v7939_v63, 0.0 }
 0xbf2   : > { %5806 = vadd.xlane.f32.xlu1 %v5805_v38  ;;  %7617 = vmatpush3.msra.mxu1 %v5834_v44 }
 0xbf3   : > { %7626 = vmatprep.subr.mxu1 %v8023_v51 }
 0xbf4   : > { %v7941_v46 = vpop.eup %7940 }
 0xbf5   : > { %v7943_v50 = vpop.eup %7942  ;;  %v5986_v53 = vpop.permute.xlu1 %5985  ;;  %v5811_v54 = vsel %vm709_vm10, %v7941_v46, 0.0 }
 0xbf6   : > { %v7945_v47 = vpop.eup %7944  ;;  %v5818_v55 = vmul.f32 %v7943_v50, %v7933_v48  ;;  %5812 = vadd.xlane.f32.xlu1 %v5811_v54 }
 0xbf7   : > { %v5824_v56 = vmul.f32 %v7945_v47, %v8947_v40 }
 0xbf8   : > { %v7947_v3 = vpop.eup %7946  ;;  %7619 = vmatmul.mubr.msk.f32.vlgmr.msra.gmra.mrb[68].mxu1 %vm709_vm10, %v5818_v55 }
 0xbf9   : > { %v5822_v58 = vmul.f32 %v7947_v3, %v7935_v33  ;;  %7627 = vmatpush3.msra.mxu1 %v5986_v53  ;;  %v6062_v26 = vpop.permute.xlu1 %6061  ;;  %7628 = vmatprep.mubr.msk.f32.mxu1 %vm8024_vm8, %v8023_v51  ;;  %v7949_v61 = vpop.eup %7948 }
 0xbfa   : > { %7632 = vmatpush3.msra.mxu0 %v6062_v26  ;;  %7636 = vmatprep.subr.mxu1 %v8023_v51  ;;  %v5828_v0 = vmul.f32 %v7949_v61, %v8951_v29  ;;  %v7951_v60 = vpop.eup %7950  ;;  %v6290_v29 = vpop.permute.xlu0 %6289 }
 0xbfb   : > { %7634 = vmatmul.mubr.msk.f32.vlgmr.msra.gmra.mrb[72].mxu0 %vm709_vm10, %v5824_v56  ;;  %7641 = vmatprep.subr.mxu0 %v8023_v51  ;;  %v5832_v5 = vmul.f32 %v7951_v60, %v8955_v34 }
 0xbfc   : > { %7629 = vmatmul.mubr.msk.f32.vlgmr.msra.gmra.mrb[70].mxu1 %vm709_vm10, %v5822_v58  ;;  %7643 = vmatprep.mubr.msk.f32.mxu0 %vm8024_vm8, %v8023_v51  ;;  %v6987_v58 = vld [vmem:[%s9111_s7] ss:$0 sm:$0xff] }
 0xbfd   : > { %7637 = vmatpush3.msra.mxu1 %v6138_v62  ;;  %v6214_v1 = vpop.permute.xlu1 %6213  ;;  %7638 = vmatprep.mubr.msk.f32.mxu1 %vm8024_vm8, %v8023_v51 }
 0xbfe   : > { %7642 = vmatpush3.msra.mxu0 %v6214_v1  ;;  %7646 = vmatprep.subr.mxu1 %v8023_v51 }
 0xbff   : > { %7644 = vmatmul.mubr.msk.f32.vlgmr.msra.gmra.mrb[74].mxu0 %vm709_vm10, %v5828_v0  ;;  %7651 = vmatprep.subr.mxu0 %v8023_v51 }
 0xc00   : > { %7653 = vmatprep.mubr.msk.f32.mxu0 %vm8024_vm8, %v8023_v51 }
 0xc07   : > { %6365 = vrot.lane.b32.xlu1 %v8242_v14, %s8036_s12  ;;  %s297_s12 = sand.u32 1, %s8010_s28  }
 0xc08   : > { %s6830_s13 = sshll.u32 %s297_s12, 6  ;;  %s9063_s9 = scalar_lea.sflag [#allocation3], %s297_s12 }
 0xc09   : > { %s299_s20 = scalar_lea.vmem [#allocation2], %s6830_s13  ;;  %s7962_s13 = scalar_lea.vmem %s7961_s10, 2048 }
 0xc0a   : > { %s6764_s23 = sshll.u32 %s299_s20, 4  ;;  %s9059_s23 = int_to_ptr.vmem [resolvable:$true] %s6764_s23 }
 0xc0b   : > { %s7956_s26 = scalar_lea.vmem %s9059_s23, 1024  ;;  %p7963_p0 = scmp.lt.s32.totalorder %s9059_s23, %s7961_s10 }
 0xc0c   : > { %p7957_p11 = scmp.ne.s32.totalorder %s9059_s23, %s7956_s26  ;;  %p7964_p1 = scmp.lt.s32.totalorder %s7962_s13, %s7956_s26 }
 0xc0e   : > { %p7958_p12 = pnand %p7957_p11, %p8123_p5  ;;  %p7965_p2 = por %p7964_p1, %p7963_p0 }
 0xc10   : > { %p7959_p13 = pneg %p7958_p12 }
 0xc12   : > { %p7966_p3 = pnand %p7965_p2, %p7959_p13 }
 0xc7f   : > { %v5807_v17 = vpop.xlane.xlu1 %5806 }
 0xc80   : > { %7952 = vrcp.f32 %v5807_v17 }
 0xc83   : > { %v5813_v4 = vpop.xlane.xlu1 %5812 }
 0xc84   : > { %7954 = vrcp.f32 %v5813_v4 }
 0xc87   : > { %v6366_v24 = vpop.permute.xlu1 %6365 }
 0xc88   : > { %7652 = vmatpush3.msra.mxu0 %v6366_v24 }
 0xc89   : > { %7654 = vmatmul.mubr.msk.f32.vlgmr.msra.gmra.mrb[76].mxu0 %vm709_vm10, %v5832_v5  ;;  %7737 = vmatprep.subr.bf16.mxu0 %v7736_v10 }
 0xc8a   : > { %v7953_v21 = vpop.eup %7952  ;;  %7739 = vmatpush3.bf16.msra.mxu0 %v7736_v10 }
 0xc8b   : > { %v5826_v40 = vmul.f32 %v7953_v21, %v7939_v63  ;;  %7741 = vmatprep.subr.bf16.mxu0 %v7740_v41 }
 0xc8d   : > { %7639 = vmatmul.mubr.msk.f32.vlgmr.msra.gmra.mrb[72].mxu1 %vm709_vm10, %v5826_v40 }
 0xc8e   : > { %v7955_v14 = vpop.eup %7954  ;;  %7647 = vmatpush3.msra.mxu1 %v6290_v29  ;;  %7648 = vmatprep.mubr.msk.f32.mxu1 %vm8024_vm8, %v8023_v51 }
 0xc8f   : > { %v5830_v23 = vmul.f32 %v7955_v14, %v7941_v46  ;;  %7656 = vmatprep.subr.mxu1 %v6441_v45  ;;  %7743 = vmatpush3.bf16.msra.mxu0 %v7740_v41 }
 0xc91   : > { %7649 = vmatmul.mubr.msk.f32.vlgmr.msra.gmra.mrb[74].mxu1 %vm709_vm10, %v5830_v23 }
 0xc92   : > { %7657 = vmatpush3.msra.mxu1 %v6441_v45 }
 0xc98   : > { %v5981_v34 = vpop.f32.mrb[70].mxu0 }
 0xc99   : > { %v7625_v49 = vpop.f32.mrb[71].mxu0 }
 0xccb   : > { %v5905_v31 = vpop.f32.mrb[68].mxu1 }
 0xccc   : > { %v7620_v15 = vpop.f32.mrb[69].mxu1  ;;  %7658 = vmatprep.mubr.msk.f32.mxu1 %vm709_vm10, %v5905_v31 }
 0xccd   : > { %7659 = vmatmul.mubr.msk.f32.vlgmr.msra.gmra.mrb[48].mxu1 %vm709_vm10, %v5981_v34 }
 0xcce   : > { %v6133_v52 = vpop.f32.mrb[72].mxu0 }
 0xccf   : > { %v6057_v35 = vpop.f32.mrb[70].mxu1  ;;  %v7635_v18 = vpop.f32.mrb[73].mxu0 }
 0xcd0   : > { %v7630_v59 = vpop.f32.mrb[71].mxu1  ;;  %7661 = vmatprep.mubr.msk.f32.mxu1 %vm709_vm10, %v6057_v35 }
 0xcd1   : > { %7662 = vmatmul.mubr.msk.f32.gmra.mrb[50].mxu1 %vm709_vm10, %v6133_v52 }
 0xcd2   : > { %v6285_v51 = vpop.f32.mrb[74].mxu0 }
 0xcd3   : > { %v7645_v19 = vpop.f32.mrb[75].mxu0 }
 0xd5c   : > { %v6437_v11 = vpop.f32.mrb[76].mxu0 }
 0xd5d   : > { %v7655_v48 = vpop.f32.mrb[77].mxu0 }
 0xd60   : > { %v6209_v28 = vpop.f32.mrb[72].mxu1 }
 0xd61   : > { %v7640_v33 = vpop.f32.mrb[73].mxu1  ;;  %7664 = vmatprep.mubr.msk.f32.mxu1 %vm709_vm10, %v6209_v28 }
 0xd62   : > { %7665 = vmatmul.mubr.msk.f32.gmra.mrb[52].mxu1 %vm709_vm10, %v6285_v51 }
 0xd64   : > { %v6361_v13 = vpop.f32.mrb[74].mxu1 }
 0xd65   : > { %v7650_v30 = vpop.f32.mrb[75].mxu1  ;;  %7667 = vmatprep.mubr.msk.f32.mxu1 %vm709_vm10, %v6361_v13 }
 0xd66   : > { %7668 = vmatmul.mubr.msk.f32.gmra.mrb[54].mxu1 %vm709_vm10, %v6437_v11 }
 0xda0   : > { %v7660_v20 = vpop.f32.mrb[48].mxu1 }
 0xda1   : > { %v6587_v2 = vadd.f32 %v7660_v20, %v6986_v57  ;;  %v6532_v36 = vpop.f32.mrb[49].mxu1 }
 0xda2   : > { %v6586_v37 = vadd.f32 %v6986_v57, %v6532_v36 }
 0xda3   : > { %v6595_v8 = vmax.f32 %v6587_v2, 0.0 }
 0xda4   : > { %v6594_v39 = vmax.f32 %v6586_v37, 0.0  ;;  %v7663_v6 = vpop.f32.mrb[50].mxu1 }
 0xda5   : > { %v6589_v9 = vadd.f32 %v7663_v6, %v6986_v57  ;;  %v6542_v12 = vpop.f32.mrb[51].mxu1 }
 0xda6   : > { %v6588_v42 = vadd.f32 %v6986_v57, %v6542_v12  ;;  %7678 = vmatprep.mubr.msk.f32.mxu0 %vm490_vm9, %v6594_v39 }
 0xda7   : > { %7679 = vmatmul.mubr.msk.f32.vlgmr.msra.gmra.mrb[78].mxu0 %vm490_vm9, %v6595_v8  ;;  %v6597_v32 = vmax.f32 %v6589_v9, 0.0 }
 0xda8   : > { %v6596_v25 = vmax.f32 %v6588_v42, 0.0 }
 0xdaa   : > { %7681 = vmatprep.mubr.msk.f32.mxu0 %vm490_vm9, %v6596_v25 }
 0xdab   : > { %7682 = vmatmul.mubr.msk.f32.gmra.mrb[80].mxu0 %vm490_vm9, %v6597_v32 }
 0xe35   : > { %v7666_v43 = vpop.f32.mrb[52].mxu1 }
 0xe36   : > { %v6591_v63 = vadd.f32 %v7666_v43, %v6986_v57  ;;  %v6552_v44 = vpop.f32.mrb[53].mxu1 }
 0xe37   : > { %v6590_v38 = vadd.f32 %v6986_v57, %v6552_v44 }
 0xe38   : > { %v6599_v53 = vmax.f32 %v6591_v63, 0.0 }
 0xe39   : > { %v6598_v46 = vmax.f32 %v6590_v38, 0.0  ;;  %v7669_v50 = vpop.f32.mrb[54].mxu1 }
 0xe3a   : > { %v6593_v54 = vadd.f32 %v7669_v50, %v6986_v57  ;;  %v6562_v47 = vpop.f32.mrb[55].mxu1 }
 0xe3b   : > { %v6592_v55 = vadd.f32 %v6986_v57, %v6562_v47  ;;  %7684 = vmatprep.mubr.msk.f32.mxu0 %vm490_vm9, %v6598_v46 }
 0xe3c   : > { %7685 = vmatmul.mubr.msk.f32.gmra.mrb[82].mxu0 %vm490_vm9, %v6599_v53  ;;  %v6601_v56 = vmax.f32 %v6593_v54, 0.0 }
 0xe3d   : > { %v6600_v3 = vmax.f32 %v6592_v55, 0.0 }
 0xe3f   : > { %7687 = vmatprep.mubr.msk.f32.mxu0 %vm490_vm9, %v6600_v3 }
 0xe40   : > { %7688 = vmatmul.mubr.msk.f32.gmra.mrb[84].mxu0 %vm490_vm9, %v6601_v56 }
 0xe7a   : > { %v7680_v26 = vpop.f32.mrb[78].mxu0 }
 0xe7b   : > { %v6709_v61 = vadd.f32 %v7680_v26, %v6987_v58  ;;  %v6703_v62 = vpop.f32.mrb[79].mxu0 }
 0xe7c   : > { %v6704_v0 = vadd.f32 %v6987_v58, %v6703_v62 }
 0xe7d   : > { %6743 = vst [vmem:[%s299_s20 + $0x8] sm:$0xff] %v6709_v61 }
 0xe7e   : > { %6742 = vst [vmem:[%s299_s20] sm:$0xff] %v6704_v0  ;;  %v7683_v1 = vpop.f32.mrb[80].mxu0 }
 0xe7f   : > { %v6719_v17 = vadd.f32 %v7683_v1, %v6987_v58  ;;  %v6713_v4 = vpop.f32.mrb[81].mxu0 }
 0xe80   : > { %v6714_v60 = vadd.f32 %v6987_v58, %v6713_v4 }
 0xe81   : > { %6745 = vst [vmem:[%s299_s20 + $0x18] sm:$0xff] %v6719_v17 }
 0xe82   : > { %6744 = vst [vmem:[%s299_s20 + $0x10] sm:$0xff] %v6714_v60 }
 0xf0f   : > { %v7686_v5 = vpop.f32.mrb[82].mxu0 }
 0xf10   : > { %v6729_v24 = vadd.f32 %v7686_v5, %v6987_v58  ;;  %v6723_v21 = vpop.f32.mrb[83].mxu0 }
 0xf11   : > { %v6724_v40 = vadd.f32 %v6987_v58, %v6723_v21 }
 0xf12   : > { %6747 = vst [vmem:[%s299_s20 + $0x28] sm:$0xff] %v6729_v24 }
 0xf13   : > { %6746 = vst [vmem:[%s299_s20 + $0x20] sm:$0xff] %v6724_v40  ;;  %v7689_v45 = vpop.f32.mrb[84].mxu0 }
 0xf14   : > { %v6739_v29 = vadd.f32 %v7689_v45, %v6987_v58  ;;  %v6733_v14 = vpop.f32.mrb[85].mxu0 }
 0xf15   : > { %v6734_v23 = vadd.f32 %v6987_v58, %v6733_v14 }
 0xf16   : > { %6749 = vst [vmem:[%s299_s20 + $0x38] sm:$0xff] %v6739_v29 }
 0xf17   : > { %6748 = vst [vmem:[%s299_s20 + $0x30] sm:$0xff] %v6734_v23 }
 0xf18   : > { %7969 = shalt.err (!%p7966_p3)
}
 0xf19   : > { %s7970_s12 = scalar_lea.hbm %s9057_s17, 1024  ;;  %s7974_s20 = scalar_lea.hbm %s9112_s8, 2048 }
 0xf1a   : > { %p7971_p4 = scmp.ne.s32.totalorder %s9057_s17, %s7970_s12  ;;  %p7975_p9 = scmp.lt.u32.totalorder %s9057_s17, %s9112_s8 }
 0xf1b   : > { %p7976_p10 = scmp.lt.u32.totalorder %s7974_s20, %s7970_s12  ;;  %p7978_p12 = scmp.lt.u32.totalorder %s7970_s12, %s9057_s17 }
 0xf1c   : > { %p7972_p7 = pnand %p7971_p4, %p8123_p5 }
 0xf1d   : > { %p7977_p11 = por %p7976_p10, %p7975_p9 }
 0xf1e   : > { %p7973_p8 = pneg %p7972_p7 }
 0xf1f   : > { %p7979_p13 = por %p7978_p12, %p7977_p11 }
 0xf21   : > { %p7980_p0 = pnand %p7979_p13, %p7973_p8 }
 0xf23   : > { %7983 = shalt.err (!%p7980_p0)
}
 0xf24   : > { %s8038_s25 = smov 128   ;;  %s8039_s26 = smov 8  }
 0xf25   : > { %7768 = dma.vmem_to_hbm [thread:$0]  (%p8123_p5), %s9059_s23, 1024, %s9057_s17, %s9063_s9, %s8038_s25, %s8038_s25, %s8039_s26  }
 0xf26 PF: > { %p7774_p1 = scmp.ge.s32.totalorder %s8018_s30, 2  ;;  %s6779_s21 = sand.u32 1, %s8006_s27  }
 0xf27   : > { %s6780_s10 = scalar_lea.sflag [#allocation3], %s6779_s21 }
 0xf28   : > { %p7771_p2 = pnand %p7774_p1, %p8127_p6 }
 0xf2a   : > { %8001 = dma.done.wait (!%p7771_p2), %s6780_s10, 1024  }
 0xf2b   : > { %8003 = vsyncadd (!%p7771_p2), %s6780_s10, 4294966272  ;;  %p18_p3 = scmp.ge.s32.totalorder %s8110_s11, 4   ;;  %s9115_s27 = smov %s8010_s28 }
 0xf2c   : > { %s9116_s28 = smov %s8014_s29  ;;  %s9117_s29 = smov %s8121_s14 }
 0xf2d   : > { %s9118_s30 = smov %s8110_s11  ;;  %20 = sbr.rel (!%p18_p3) target bundleno = 3 (0x3), region = 87 }
 0xf34   :  { %6785 = vsyncpa [#allocation3], 1 }
 0xf35   :  { %6787 = vsyncpa [#allocation3 + $0x1], 1 }

</bundles_post_ra>
